<compile_context>
chip_gen: v7x
topology: tpu7x:2x2x1
jax: 0.10.0
libtpu: 0.0.40
codegen_flags: <defaults>
</compile_context>

<pallas_src>
import jax
import jax.numpy as jnp
from jax.experimental import pallas as pl
from jax.experimental.pallas import tpu as pltpu

LANE = 128
SUBLANE = 8


def lstm_fc_kernel(x_ref, wih_ref, whh_ref, b_ref, wfc_ref, bfc_ref,
                   out_ref, h_ref, c_ref, xg_ref):
    """One T-block of the LSTM recurrence + final Linear (on the last block).

    x_ref  : [T_blk*Bp, Ep]   embedded tokens, time-major, rows t*Bp..t*Bp+Bp (bf16)
    wih_ref: [Ep,  4*Hp]      input->hidden weights, gate/E padded to lane mults (bf16)
    whh_ref: [Hp, 4*Hp]       hidden->hidden weights, padded (bf16)
    b_ref  : [1,  4*Hp]       b_ih + b_hh, padded (f32)
    wfc_ref: [Hp, Op]         fc weight, padded (bf16)
    bfc_ref: [1,  Op]         fc bias, padded (f32)
    out_ref: [Bp, Op]         logits (padded; real output is rows 0..B, col 0..O)
    h_ref, c_ref: [Bp, Hp]    recurrent state carried across grid steps (f32)
    xg_ref : [T_blk*Bp, 4*Hp] hoisted input projection for this block (f32)
    """
    Bp, Hp = h_ref.shape
    T_blk = x_ref.shape[0] // Bp

    @pl.when(pl.program_id(0) == 0)
    def _init():
        h_ref[...] = jnp.zeros_like(h_ref)
        c_ref[...] = jnp.zeros_like(c_ref)

    # --- Hoisted input projection + bias: one big MXU matmul for the whole block.
    xg_ref[...] = (jnp.dot(x_ref[...], wih_ref[...],
                           preferred_element_type=jnp.float32)
                   + b_ref[...])                                   # [T_blk*Bp, 4*Hp] f32

    whh = whh_ref[...]                                             # resident, loaded once
    h = h_ref[...]
    c = c_ref[...]

    # --- Fully unrolled recurrence (static trip count; only h @ W_hh on the chain).
    for t in range(T_blk):
        gates = (xg_ref[t * Bp:(t + 1) * Bp, :]
                 + jnp.dot(h.astype(whh.dtype), whh,
                           preferred_element_type=jnp.float32))    # [Bp, 4*Hp] f32
        # Lane-aligned gate slabs (Hp is a multiple of 128) -> free slices.
        i_g = jax.nn.sigmoid(gates[:, 0 * Hp:1 * Hp])
        f_g = jax.nn.sigmoid(gates[:, 1 * Hp:2 * Hp])
        g_g = jnp.tanh(gates[:, 2 * Hp:3 * Hp])
        o_g = jax.nn.sigmoid(gates[:, 3 * Hp:4 * Hp])
        c = f_g * c + i_g * g_g
        h = o_g * jnp.tanh(c)

    h_ref[...] = h
    c_ref[...] = c

    @pl.when(pl.program_id(0) == pl.num_programs(0) - 1)
    def _final():
        # Dropout is identity in eval mode.  Lane/sublane-dense (padded) output store.
        out_ref[...] = (jnp.dot(h.astype(wfc_ref.dtype), wfc_ref[...],
                                preferred_element_type=jnp.float32)
                        + bfc_ref[...])


def _round_up(x, m):
    return ((x + m - 1) // m) * m


def lstm_sentiment_forward(tokens, emb_table, w_ih, w_hh, b_ih, b_hh, w_fc, b_fc,
                           *, t_block=None, matmul_dtype=jnp.bfloat16):
    """Glue: embedding gather + padding/layout, then one pallas_call."""
    B, T = tokens.shape
    E = emb_table.shape[1]
    H = w_hh.shape[1]
    O = w_fc.shape[0]
    Bp = _round_up(max(B, SUBLANE), SUBLANE)
    Ep = _round_up(E, LANE)
    Hp = _round_up(H, LANE)
    Op = _round_up(O, LANE)
    G = 4 * Hp
    mm_itemsize = jnp.dtype(matmul_dtype).itemsize

    # --- T-block selection: small enough to double-buffer the x block and keep the
    #     hoisted-projection scratch modest; trip count small enough to unroll.
    if t_block is None:
        best = None
        for cand in range(min(T, 32), 0, -1):
            if T % cand:
                continue
            if cand * Bp * Ep * mm_itemsize > (2 << 20):      # x block (double-buffered)
                continue
            if cand * Bp * G * 4 > (6 << 20):                 # hoisted projection scratch
                continue
            best = cand
            break
        t_block = best if best is not None else 1
    assert T % t_block == 0

    # --- Embedding gather (XLA), pad batch + embedding dims, time-major 2D layout.
    embedded = jnp.take(emb_table, tokens, axis=0)                 # [B, T, E]
    embedded = jnp.pad(embedded, ((0, Bp - B), (0, 0), (0, Ep - E)))
    x_tm = jnp.transpose(embedded, (1, 0, 2)).reshape(T * Bp, Ep)
    x_tm = x_tm.astype(matmul_dtype)

    # --- Weight layout: PyTorch gate order (i, f, g, o); pad each gate's H to Hp, E to Ep.
    wih4 = jnp.pad(w_ih.reshape(4, H, E),
                   ((0, 0), (0, Hp - H), (0, Ep - E)))             # [4, Hp, Ep]
    wih_p = jnp.transpose(wih4, (2, 0, 1)).reshape(Ep, G).astype(matmul_dtype)

    whh4 = jnp.pad(w_hh.reshape(4, H, H),
                   ((0, 0), (0, Hp - H), (0, Hp - H)))             # [4, Hp, Hp]
    whh_p = jnp.transpose(whh4, (2, 0, 1)).reshape(Hp, G).astype(matmul_dtype)

    bias_p = jnp.pad((b_ih + b_hh).reshape(4, H),
                     ((0, 0), (0, Hp - H))).reshape(1, G).astype(jnp.float32)

    wfc_p = jnp.pad(w_fc.T, ((0, Hp - H), (0, Op - O))).astype(matmul_dtype)   # [Hp, Op]
    bfc_p = jnp.pad(b_fc, (0, Op - O)).reshape(1, Op).astype(jnp.float32)

    n_blocks = T // t_block
    blk_rows = t_block * Bp

    # --- VMEM budget (explicit so v7x's 64 MiB VMEM is respected at big shapes).
    x_blk_bytes = blk_rows * Ep * mm_itemsize
    w_bytes = (Ep * G + Hp * G + Hp * Op) * mm_itemsize + (G + Op) * 4
    scratch_bytes = 2 * Bp * Hp * 4 + blk_rows * G * 4
    out_bytes = Bp * Op * 4
    est = 2 * x_blk_bytes + w_bytes + scratch_bytes + out_bytes
    vmem_limit = int(min(max(4 * est, 16 << 20), 48 << 20))

    out_padded = pl.pallas_call(
        lstm_fc_kernel,
        out_shape=jax.ShapeDtypeStruct((Bp, Op), jnp.float32),
        grid_spec=pltpu.PrefetchScalarGridSpec(
            num_scalar_prefetch=0,
            grid=(n_blocks,),
            in_specs=[
                pl.BlockSpec((blk_rows, Ep), lambda t: (t, 0)),  # x: tiled over T
                pl.BlockSpec((Ep, G), lambda t: (0, 0)),         # W_ih (resident)
                pl.BlockSpec((Hp, G), lambda t: (0, 0)),         # W_hh (resident)
                pl.BlockSpec((1, G), lambda t: (0, 0)),          # bias (resident)
                pl.BlockSpec((Hp, Op), lambda t: (0, 0)),        # W_fc (resident)
                pl.BlockSpec((1, Op), lambda t: (0, 0)),         # b_fc (resident)
            ],
            out_specs=pl.BlockSpec((Bp, Op), lambda t: (0, 0)),
            scratch_shapes=[
                pltpu.VMEM((Bp, Hp), jnp.float32),        # h carry
                pltpu.VMEM((Bp, Hp), jnp.float32),        # c carry
                pltpu.VMEM((blk_rows, G), jnp.float32),   # hoisted input projection
            ],
        ),
        compiler_params=pltpu.CompilerParams(
            dimension_semantics=("arbitrary",),
            vmem_limit_bytes=vmem_limit,
        ),
    )(x_tm, wih_p, whh_p, bias_p, wfc_p, bfc_p)

    return out_padded[:B, :O]


def reference_forward(tokens, emb_table, w_ih, w_hh, b_ih, b_hh, w_fc, b_fc,
                      matmul_dtype=jnp.float32):
    """Pure-JAX reference mirroring PyTorch nn.LSTM + nn.Linear (eval mode).

    With matmul_dtype=bf16 it mirrors the kernel's numerics (bf16 MXU inputs,
    f32 accumulation and f32 gate math) for a tight correctness check.
    """
    B, T = tokens.shape
    H = w_hh.shape[1]
    x = jnp.take(emb_table, tokens, axis=0).astype(matmul_dtype)   # [B, T, E]
    wih = w_ih.T.astype(matmul_dtype)
    whh = w_hh.T.astype(matmul_dtype)
    wfc = w_fc.T.astype(matmul_dtype)
    bias = (b_ih + b_hh).astype(jnp.float32)

    def step(carry, x_t):
        h, c = carry
        gates = (jnp.dot(x_t, wih, preferred_element_type=jnp.float32)
                 + jnp.dot(h.astype(matmul_dtype), whh,
                           preferred_element_type=jnp.float32)
                 + bias)
        i = jax.nn.sigmoid(gates[:, 0 * H:1 * H])
        f = jax.nn.sigmoid(gates[:, 1 * H:2 * H])
        g = jnp.tanh(gates[:, 2 * H:3 * H])
        o = jax.nn.sigmoid(gates[:, 3 * H:4 * H])
        c = f * c + i * g
        h = o * jnp.tanh(c)
        return (h, c), None

    h0 = jnp.zeros((B, H), jnp.float32)
    c0 = jnp.zeros((B, H), jnp.float32)
    (h_n, _), _ = jax.lax.scan(step, (h0, c0), jnp.transpose(x, (1, 0, 2)))
    return (jnp.dot(h_n.astype(matmul_dtype), wfc,
                    preferred_element_type=jnp.float32)
            + b_fc.astype(jnp.float32))


if __name__ == "__main__":
    # Small, deterministic shapes consistent with the module's forward.
    vocab_size = 50
    embedding_dim = 32
    hidden_dim = 32
    output_dim = 1
    batch = 2
    seq_len = 8

    key = jax.random.PRNGKey(0)
    k_tok, k_emb, k_wih, k_whh, k_bih, k_bhh, k_wfc, k_bfc = jax.random.split(key, 8)

    tokens = jax.random.randint(k_tok, (batch, seq_len), 0, vocab_size, dtype=jnp.int32)

    emb_table = jax.random.normal(k_emb, (vocab_size, embedding_dim), jnp.float32)
    s = 1.0 / jnp.sqrt(jnp.float32(hidden_dim))
    w_ih = jax.random.uniform(k_wih, (4 * hidden_dim, embedding_dim), jnp.float32, -s, s)
    w_hh = jax.random.uniform(k_whh, (4 * hidden_dim, hidden_dim), jnp.float32, -s, s)
    b_ih = jax.random.uniform(k_bih, (4 * hidden_dim,), jnp.float32, -s, s)
    b_hh = jax.random.uniform(k_bhh, (4 * hidden_dim,), jnp.float32, -s, s)
    w_fc = jax.random.uniform(k_wfc, (output_dim, hidden_dim), jnp.float32, -s, s)
    b_fc = jax.random.uniform(k_bfc, (output_dim,), jnp.float32, -s, s)

    # t_block=4 -> grid of 2 T-blocks, exercising the carried h/c scratch path.
    out = lstm_sentiment_forward(tokens, emb_table, w_ih, w_hh, b_ih, b_hh,
                                 w_fc, b_fc, t_block=4)
    out = jax.block_until_ready(out)
    assert out.shape == (batch, output_dim)

    # Tight check: reference with the same bf16 MXU-input / f32-accum numerics.
    ref_q = reference_forward(tokens, emb_table, w_ih, w_hh, b_ih, b_hh, w_fc, b_fc,
                              matmul_dtype=jnp.bfloat16)
    assert jnp.allclose(out, ref_q, atol=1e-3, rtol=1e-3), (out, ref_q)

    # Fidelity sanity check vs. full-f32 PyTorch-equivalent math (bf16 matmul
    # inputs introduce ~1e-3-level differences).
    ref_f32 = reference_forward(tokens, emb_table, w_ih, w_hh, b_ih, b_hh, w_fc, b_fc,
                                matmul_dtype=jnp.float32)
    assert jnp.allclose(out, ref_f32, atol=2e-2, rtol=2e-2), (out, ref_f32)

    print("KERNEL_OK")
</pallas_src>

<mosaic_0001>
module attributes {stable_mosaic.version = 11 : i64} {
  func.func @lstm_fc_kernel(%arg0: i32, %arg1: memref<32x128xbf16, #tpu.memory_space<vmem>>, %arg2: memref<128x512xbf16, #tpu.memory_space<vmem>>, %arg3: memref<128x512xbf16, #tpu.memory_space<vmem>>, %arg4: memref<1x512xf32, #tpu.memory_space<vmem>>, %arg5: memref<128x128xbf16, #tpu.memory_space<vmem>>, %arg6: memref<1x128xf32, #tpu.memory_space<vmem>>, %arg7: memref<8x128xf32, #tpu.memory_space<vmem>>, %arg8: memref<8x128xf32, #tpu.memory_space<vmem>>, %arg9: memref<8x128xf32, #tpu.memory_space<vmem>>, %arg10: memref<32x512xf32, #tpu.memory_space<vmem>>) attributes {dimension_semantics = [#tpu.dimension_semantics<arbitrary>], iteration_bounds = array<i64: 2>, scalar_prefetch = 0 : i64, scratch_operands = 3 : i64, tpu.core_type = #tpu.core_type<tc>, window_params = [{transform_indices = @transform_0, window_bounds = array<i64: 32, 128>}, {pipeline_mode = #tpu.pipeline_mode<synchronous>, transform_indices = @transform_1, window_bounds = array<i64: 128, 512>}, {pipeline_mode = #tpu.pipeline_mode<synchronous>, transform_indices = @transform_2, window_bounds = array<i64: 128, 512>}, {pipeline_mode = #tpu.pipeline_mode<synchronous>, transform_indices = @transform_3, window_bounds = array<i64: 1, 512>}, {pipeline_mode = #tpu.pipeline_mode<synchronous>, transform_indices = @transform_4, window_bounds = array<i64: 128, 128>}, {pipeline_mode = #tpu.pipeline_mode<synchronous>, transform_indices = @transform_5, window_bounds = array<i64: 1, 128>}, {pipeline_mode = #tpu.pipeline_mode<synchronous>, transform_indices = @transform_6, window_bounds = array<i64: 8, 128>}]} {
    %c0_i32 = arith.constant 0 : i32
    %0 = arith.cmpi eq, %arg0, %c0_i32 : i32
    %1 = arith.extui %0 : i1 to i32
    %c0_i32_0 = arith.constant 0 : i32
    %2 = arith.cmpi ne, %1, %c0_i32_0 : i32
    scf.if %2 {
      %cst_40 = arith.constant 0.000000e+00 : f32
      %134 = vector.broadcast %cst_40 : f32 to vector<8x128xf32>
      %c0_41 = arith.constant 0 : index
      %c0_42 = arith.constant 0 : index
      %135 = vector.load %arg8[%c0_41, %c0_42] : memref<8x128xf32, #tpu.memory_space<vmem>>, vector<8x128xf32>
      tpu.vector_store %arg8[%c0_41, %c0_42], %134 {strides = array<i32>} : memref<8x128xf32, #tpu.memory_space<vmem>>, vector<8x128xf32>,
      %cst_43 = arith.constant 0.000000e+00 : f32
      %136 = vector.broadcast %cst_43 : f32 to vector<8x128xf32>
      %c0_44 = arith.constant 0 : index
      %c0_45 = arith.constant 0 : index
      %137 = vector.load %arg9[%c0_44, %c0_45] : memref<8x128xf32, #tpu.memory_space<vmem>>, vector<8x128xf32>
      tpu.vector_store %arg9[%c0_44, %c0_45], %136 {strides = array<i32>} : memref<8x128xf32, #tpu.memory_space<vmem>>, vector<8x128xf32>,
    } else {
    }
    %c0 = arith.constant 0 : index
    %c0_1 = arith.constant 0 : index
    %3 = vector.load %arg1[%c0, %c0_1] : memref<32x128xbf16, #tpu.memory_space<vmem>>, vector<32x128xbf16>
    %c0_2 = arith.constant 0 : index
    %c0_3 = arith.constant 0 : index
    %4 = vector.load %arg2[%c0_2, %c0_3] : memref<128x512xbf16, #tpu.memory_space<vmem>>, vector<128x512xbf16>
    %cst = arith.constant dense<0.000000e+00> : vector<32x512xf32>
    %5 = tpu.matmul %3, %4, %cst {dimension_numbers = #tpu.dot_dimension_numbers<[1], [0], [0], [1], [0, 0, 1, 1], [], []>} : vector<32x128xbf16>, vector<128x512xbf16>, vector<32x512xf32> -> vector<32x512xf32>
    %c0_4 = arith.constant 0 : index
    %c0_5 = arith.constant 0 : index
    %6 = vector.load %arg4[%c0_4, %c0_5] : memref<1x512xf32, #tpu.memory_space<vmem>>, vector<1x512xf32>
    %7 = vector.broadcast %6 : vector<1x512xf32> to vector<32x512xf32>
    %8 = arith.addf %5, %7 : vector<32x512xf32>
    %c0_6 = arith.constant 0 : index
    %c0_7 = arith.constant 0 : index
    %9 = vector.load %arg10[%c0_6, %c0_7] : memref<32x512xf32, #tpu.memory_space<vmem>>, vector<32x512xf32>
    tpu.vector_store %arg10[%c0_6, %c0_7], %8 {strides = array<i32>} : memref<32x512xf32, #tpu.memory_space<vmem>>, vector<32x512xf32>,
    %c0_8 = arith.constant 0 : index
    %c0_9 = arith.constant 0 : index
    %10 = vector.load %arg3[%c0_8, %c0_9] : memref<128x512xbf16, #tpu.memory_space<vmem>>, vector<128x512xbf16>
    %c0_10 = arith.constant 0 : index
    %c0_11 = arith.constant 0 : index
    %11 = vector.load %arg8[%c0_10, %c0_11] : memref<8x128xf32, #tpu.memory_space<vmem>>, vector<8x128xf32>
    %c0_12 = arith.constant 0 : index
    %c0_13 = arith.constant 0 : index
    %12 = vector.load %arg9[%c0_12, %c0_13] : memref<8x128xf32, #tpu.memory_space<vmem>>, vector<8x128xf32>
    %c0_14 = arith.constant 0 : index
    %c0_15 = arith.constant 0 : index
    %13 = vector.load %arg10[%c0_14, %c0_15] : memref<32x512xf32, #tpu.memory_space<vmem>>, vector<8x512xf32>
    %14 = arith.truncf %11 : vector<8x128xf32> to vector<8x128xbf16>
    %cst_16 = arith.constant dense<0.000000e+00> : vector<8x512xf32>
    %15 = tpu.matmul %14, %10, %cst_16 {dimension_numbers = #tpu.dot_dimension_numbers<[1], [0], [0], [1], [0, 0, 1, 1], [], []>} : vector<8x128xbf16>, vector<128x512xbf16>, vector<8x512xf32> -> vector<8x512xf32>
    %16 = arith.addf %13, %15 : vector<8x512xf32>
    %17 = vector.extract_strided_slice %16 {offsets = [0, 0], sizes = [8, 128], strides = [1, 1]} : vector<8x512xf32> to vector<8x128xf32>
    %18 = arith.negf %17 : vector<8x128xf32>
    %19 = math.exp %18 : vector<8x128xf32>
    %cst_17 = arith.constant 1.000000e+00 : f32
    %20 = vector.broadcast %cst_17 : f32 to vector<8x128xf32>
    %21 = arith.addf %20, %19 : vector<8x128xf32>
    %22 = arith.divf %20, %21 : vector<8x128xf32>
    %23 = vector.extract_strided_slice %16 {offsets = [0, 128], sizes = [8, 128], strides = [1, 1]} : vector<8x512xf32> to vector<8x128xf32>
    %24 = arith.negf %23 : vector<8x128xf32>
    %25 = math.exp %24 : vector<8x128xf32>
    %cst_18 = arith.constant 1.000000e+00 : f32
    %26 = vector.broadcast %cst_18 : f32 to vector<8x128xf32>
    %27 = arith.addf %26, %25 : vector<8x128xf32>
    %28 = arith.divf %26, %27 : vector<8x128xf32>
    %29 = vector.extract_strided_slice %16 {offsets = [0, 256], sizes = [8, 128], strides = [1, 1]} : vector<8x512xf32> to vector<8x128xf32>
    %30 = math.tanh %29 : vector<8x128xf32>
    %31 = vector.extract_strided_slice %16 {offsets = [0, 384], sizes = [8, 128], strides = [1, 1]} : vector<8x512xf32> to vector<8x128xf32>
    %32 = arith.negf %31 : vector<8x128xf32>
    %33 = math.exp %32 : vector<8x128xf32>
    %cst_19 = arith.constant 1.000000e+00 : f32
    %34 = vector.broadcast %cst_19 : f32 to vector<8x128xf32>
    %35 = arith.addf %34, %33 : vector<8x128xf32>
    %36 = arith.divf %34, %35 : vector<8x128xf32>
    %37 = arith.mulf %28, %12 : vector<8x128xf32>
    %38 = arith.mulf %22, %30 : vector<8x128xf32>
    %39 = arith.addf %37, %38 : vector<8x128xf32>
    %40 = math.tanh %39 : vector<8x128xf32>
    %41 = arith.mulf %36, %40 : vector<8x128xf32>
    %c8 = arith.constant 8 : index
    %c0_20 = arith.constant 0 : index
    %42 = vector.load %arg10[%c8, %c0_20] : memref<32x512xf32, #tpu.memory_space<vmem>>, vector<8x512xf32>
    %43 = arith.truncf %41 : vector<8x128xf32> to vector<8x128xbf16>
    %cst_21 = arith.constant dense<0.000000e+00> : vector<8x512xf32>
    %44 = tpu.matmul %43, %10, %cst_21 {dimension_numbers = #tpu.dot_dimension_numbers<[1], [0], [0], [1], [0, 0, 1, 1], [], []>} : vector<8x128xbf16>, vector<128x512xbf16>, vector<8x512xf32> -> vector<8x512xf32>
    %45 = arith.addf %42, %44 : vector<8x512xf32>
    %46 = vector.extract_strided_slice %45 {offsets = [0, 0], sizes = [8, 128], strides = [1, 1]} : vector<8x512xf32> to vector<8x128xf32>
    %47 = arith.negf %46 : vector<8x128xf32>
    %48 = math.exp %47 : vector<8x128xf32>
    %cst_22 = arith.constant 1.000000e+00 : f32
    %49 = vector.broadcast %cst_22 : f32 to vector<8x128xf32>
    %50 = arith.addf %49, %48 : vector<8x128xf32>
    %51 = arith.divf %49, %50 : vector<8x128xf32>
    %52 = vector.extract_strided_slice %45 {offsets = [0, 128], sizes = [8, 128], strides = [1, 1]} : vector<8x512xf32> to vector<8x128xf32>
    %53 = arith.negf %52 : vector<8x128xf32>
    %54 = math.exp %53 : vector<8x128xf32>
    %cst_23 = arith.constant 1.000000e+00 : f32
    %55 = vector.broadcast %cst_23 : f32 to vector<8x128xf32>
    %56 = arith.addf %55, %54 : vector<8x128xf32>
    %57 = arith.divf %55, %56 : vector<8x128xf32>
    %58 = vector.extract_strided_slice %45 {offsets = [0, 256], sizes = [8, 128], strides = [1, 1]} : vector<8x512xf32> to vector<8x128xf32>
    %59 = math.tanh %58 : vector<8x128xf32>
    %60 = vector.extract_strided_slice %45 {offsets = [0, 384], sizes = [8, 128], strides = [1, 1]} : vector<8x512xf32> to vector<8x128xf32>
    %61 = arith.negf %60 : vector<8x128xf32>
    %62 = math.exp %61 : vector<8x128xf32>
    %cst_24 = arith.constant 1.000000e+00 : f32
    %63 = vector.broadcast %cst_24 : f32 to vector<8x128xf32>
    %64 = arith.addf %63, %62 : vector<8x128xf32>
    %65 = arith.divf %63, %64 : vector<8x128xf32>
    %66 = arith.mulf %57, %39 : vector<8x128xf32>
    %67 = arith.mulf %51, %59 : vector<8x128xf32>
    %68 = arith.addf %66, %67 : vector<8x128xf32>
    %69 = math.tanh %68 : vector<8x128xf32>
    %70 = arith.mulf %65, %69 : vector<8x128xf32>
    %c16 = arith.constant 16 : index
    %c0_25 = arith.constant 0 : index
    %71 = vector.load %arg10[%c16, %c0_25] : memref<32x512xf32, #tpu.memory_space<vmem>>, vector<8x512xf32>
    %72 = arith.truncf %70 : vector<8x128xf32> to vector<8x128xbf16>
    %cst_26 = arith.constant dense<0.000000e+00> : vector<8x512xf32>
    %73 = tpu.matmul %72, %10, %cst_26 {dimension_numbers = #tpu.dot_dimension_numbers<[1], [0], [0], [1], [0, 0, 1, 1], [], []>} : vector<8x128xbf16>, vector<128x512xbf16>, vector<8x512xf32> -> vector<8x512xf32>
    %74 = arith.addf %71, %73 : vector<8x512xf32>
    %75 = vector.extract_strided_slice %74 {offsets = [0, 0], sizes = [8, 128], strides = [1, 1]} : vector<8x512xf32> to vector<8x128xf32>
    %76 = arith.negf %75 : vector<8x128xf32>
    %77 = math.exp %76 : vector<8x128xf32>
    %cst_27 = arith.constant 1.000000e+00 : f32
    %78 = vector.broadcast %cst_27 : f32 to vector<8x128xf32>
    %79 = arith.addf %78, %77 : vector<8x128xf32>
    %80 = arith.divf %78, %79 : vector<8x128xf32>
    %81 = vector.extract_strided_slice %74 {offsets = [0, 128], sizes = [8, 128], strides = [1, 1]} : vector<8x512xf32> to vector<8x128xf32>
    %82 = arith.negf %81 : vector<8x128xf32>
    %83 = math.exp %82 : vector<8x128xf32>
    %cst_28 = arith.constant 1.000000e+00 : f32
    %84 = vector.broadcast %cst_28 : f32 to vector<8x128xf32>
    %85 = arith.addf %84, %83 : vector<8x128xf32>
    %86 = arith.divf %84, %85 : vector<8x128xf32>
    %87 = vector.extract_strided_slice %74 {offsets = [0, 256], sizes = [8, 128], strides = [1, 1]} : vector<8x512xf32> to vector<8x128xf32>
    %88 = math.tanh %87 : vector<8x128xf32>
    %89 = vector.extract_strided_slice %74 {offsets = [0, 384], sizes = [8, 128], strides = [1, 1]} : vector<8x512xf32> to vector<8x128xf32>
    %90 = arith.negf %89 : vector<8x128xf32>
    %91 = math.exp %90 : vector<8x128xf32>
    %cst_29 = arith.constant 1.000000e+00 : f32
    %92 = vector.broadcast %cst_29 : f32 to vector<8x128xf32>
    %93 = arith.addf %92, %91 : vector<8x128xf32>
    %94 = arith.divf %92, %93 : vector<8x128xf32>
    %95 = arith.mulf %86, %68 : vector<8x128xf32>
    %96 = arith.mulf %80, %88 : vector<8x128xf32>
    %97 = arith.addf %95, %96 : vector<8x128xf32>
    %98 = math.tanh %97 : vector<8x128xf32>
    %99 = arith.mulf %94, %98 : vector<8x128xf32>
    %c24 = arith.constant 24 : index
    %c0_30 = arith.constant 0 : index
    %100 = vector.load %arg10[%c24, %c0_30] : memref<32x512xf32, #tpu.memory_space<vmem>>, vector<8x512xf32>
    %101 = arith.truncf %99 : vector<8x128xf32> to vector<8x128xbf16>
    %cst_31 = arith.constant dense<0.000000e+00> : vector<8x512xf32>
    %102 = tpu.matmul %101, %10, %cst_31 {dimension_numbers = #tpu.dot_dimension_numbers<[1], [0], [0], [1], [0, 0, 1, 1], [], []>} : vector<8x128xbf16>, vector<128x512xbf16>, vector<8x512xf32> -> vector<8x512xf32>
    %103 = arith.addf %100, %102 : vector<8x512xf32>
    %104 = vector.extract_strided_slice %103 {offsets = [0, 0], sizes = [8, 128], strides = [1, 1]} : vector<8x512xf32> to vector<8x128xf32>
    %105 = arith.negf %104 : vector<8x128xf32>
    %106 = math.exp %105 : vector<8x128xf32>
    %cst_32 = arith.constant 1.000000e+00 : f32
    %107 = vector.broadcast %cst_32 : f32 to vector<8x128xf32>
    %108 = arith.addf %107, %106 : vector<8x128xf32>
    %109 = arith.divf %107, %108 : vector<8x128xf32>
    %110 = vector.extract_strided_slice %103 {offsets = [0, 128], sizes = [8, 128], strides = [1, 1]} : vector<8x512xf32> to vector<8x128xf32>
    %111 = arith.negf %110 : vector<8x128xf32>
    %112 = math.exp %111 : vector<8x128xf32>
    %cst_33 = arith.constant 1.000000e+00 : f32
    %113 = vector.broadcast %cst_33 : f32 to vector<8x128xf32>
    %114 = arith.addf %113, %112 : vector<8x128xf32>
    %115 = arith.divf %113, %114 : vector<8x128xf32>
    %116 = vector.extract_strided_slice %103 {offsets = [0, 256], sizes = [8, 128], strides = [1, 1]} : vector<8x512xf32> to vector<8x128xf32>
    %117 = math.tanh %116 : vector<8x128xf32>
    %118 = vector.extract_strided_slice %103 {offsets = [0, 384], sizes = [8, 128], strides = [1, 1]} : vector<8x512xf32> to vector<8x128xf32>
    %119 = arith.negf %118 : vector<8x128xf32>
    %120 = math.exp %119 : vector<8x128xf32>
    %cst_34 = arith.constant 1.000000e+00 : f32
    %121 = vector.broadcast %cst_34 : f32 to vector<8x128xf32>
    %122 = arith.addf %121, %120 : vector<8x128xf32>
    %123 = arith.divf %121, %122 : vector<8x128xf32>
    %124 = arith.mulf %115, %97 : vector<8x128xf32>
    %125 = arith.mulf %109, %117 : vector<8x128xf32>
    %126 = arith.addf %124, %125 : vector<8x128xf32>
    %127 = math.tanh %126 : vector<8x128xf32>
    %128 = arith.mulf %123, %127 : vector<8x128xf32>
    %c0_35 = arith.constant 0 : index
    %c0_36 = arith.constant 0 : index
    %129 = vector.load %arg8[%c0_35, %c0_36] : memref<8x128xf32, #tpu.memory_space<vmem>>, vector<8x128xf32>
    tpu.vector_store %arg8[%c0_35, %c0_36], %128 {strides = array<i32>} : memref<8x128xf32, #tpu.memory_space<vmem>>, vector<8x128xf32>,
    %c0_37 = arith.constant 0 : index
    %c0_38 = arith.constant 0 : index
    %130 = vector.load %arg9[%c0_37, %c0_38] : memref<8x128xf32, #tpu.memory_space<vmem>>, vector<8x128xf32>
    tpu.vector_store %arg9[%c0_37, %c0_38], %126 {strides = array<i32>} : memref<8x128xf32, #tpu.memory_space<vmem>>, vector<8x128xf32>,
    %c1_i32 = arith.constant 1 : i32
    %131 = arith.cmpi eq, %arg0, %c1_i32 : i32
    %132 = arith.extui %131 : i1 to i32
    %c0_i32_39 = arith.constant 0 : i32
    %133 = arith.cmpi ne, %132, %c0_i32_39 : i32
    scf.if %133 {
      %134 = arith.truncf %128 : vector<8x128xf32> to vector<8x128xbf16>
      %c0_40 = arith.constant 0 : index
      %c0_41 = arith.constant 0 : index
      %135 = vector.load %arg5[%c0_40, %c0_41] : memref<128x128xbf16, #tpu.memory_space<vmem>>, vector<128x128xbf16>
      %cst_42 = arith.constant dense<0.000000e+00> : vector<8x128xf32>
      %136 = tpu.matmul %134, %135, %cst_42 {dimension_numbers = #tpu.dot_dimension_numbers<[1], [0], [0], [1], [0, 0, 1, 1], [], []>} : vector<8x128xbf16>, vector<128x128xbf16>, vector<8x128xf32> -> vector<8x128xf32>
      %c0_43 = arith.constant 0 : index
      %c0_44 = arith.constant 0 : index
      %137 = vector.load %arg6[%c0_43, %c0_44] : memref<1x128xf32, #tpu.memory_space<vmem>>, vector<1x128xf32>
      %138 = vector.broadcast %137 : vector<1x128xf32> to vector<8x128xf32>
      %139 = arith.addf %136, %138 : vector<8x128xf32>
      %c0_45 = arith.constant 0 : index
      %c0_46 = arith.constant 0 : index
      %140 = vector.load %arg7[%c0_45, %c0_46] : memref<8x128xf32, #tpu.memory_space<vmem>>, vector<8x128xf32>
      tpu.vector_store %arg7[%c0_45, %c0_46], %139 {strides = array<i32>} : memref<8x128xf32, #tpu.memory_space<vmem>>, vector<8x128xf32>,
    } else {
    }
    return
  }
  func.func @transform_0(%arg0: i32) -> (i32, i32) {
    %c0_i32 = arith.constant 0 : i32
    %c0_i32_0 = arith.constant 0 : i32
    return %arg0, %c0_i32 : i32, i32
  }
  func.func @transform_1(%arg0: i32) -> (i32, i32) {
    %c0_i32 = arith.constant 0 : i32
    %c0_i32_0 = arith.constant 0 : i32
    %c0_i32_1 = arith.constant 0 : i32
    return %c0_i32, %c0_i32_0 : i32, i32
  }
  func.func @transform_2(%arg0: i32) -> (i32, i32) {
    %c0_i32 = arith.constant 0 : i32
    %c0_i32_0 = arith.constant 0 : i32
    %c0_i32_1 = arith.constant 0 : i32
    return %c0_i32, %c0_i32_0 : i32, i32
  }
  func.func @transform_3(%arg0: i32) -> (i32, i32) {
    %c0_i32 = arith.constant 0 : i32
    %c0_i32_0 = arith.constant 0 : i32
    %c0_i32_1 = arith.constant 0 : i32
    return %c0_i32, %c0_i32_0 : i32, i32
  }
  func.func @transform_4(%arg0: i32) -> (i32, i32) {
    %c0_i32 = arith.constant 0 : i32
    %c0_i32_0 = arith.constant 0 : i32
    %c0_i32_1 = arith.constant 0 : i32
    return %c0_i32, %c0_i32_0 : i32, i32
  }
  func.func @transform_5(%arg0: i32) -> (i32, i32) {
    %c0_i32 = arith.constant 0 : i32
    %c0_i32_0 = arith.constant 0 : i32
    %c0_i32_1 = arith.constant 0 : i32
    return %c0_i32, %c0_i32_0 : i32, i32
  }
  func.func @transform_6(%arg0: i32) -> (i32, i32) {
    %c0_i32 = arith.constant 0 : i32
    %c0_i32_0 = arith.constant 0 : i32
    %c0_i32_1 = arith.constant 0 : i32
    return %c0_i32, %c0_i32_0 : i32, i32
  }
}

</mosaic_0001>

<bundles_post_ra>
// kernel: tpu_custom_call.1
= control target key start
LH: loop header
LB: loop body
LE: loop exit
PB: predicated region body
PF: predicated region fallthrough
CT: control target
= control target key end

     0   :  { %11 = vsyncpa [#allocation6], 0  ;;  %s2645_s0 = inlined_call_operand.hbm [shape: bf16[64,128], index: 0, kind: input, shape index: {}]   ;;  %s2646_s1 = inlined_call_operand.hbm [shape: bf16[128,512], index: 1, kind: input, shape index: {}]   ;;  %s2647_s2 = inlined_call_operand.hbm [shape: bf16[128,512], index: 2, kind: input, shape index: {}]   ;;  %s2648_s3 = inlined_call_operand.vmem [shape: f32[1,512], index: 3, kind: input, shape index: {}]   ;;  %s2649_s4 = inlined_call_operand.hbm [shape: bf16[128,128], index: 4, kind: input, shape index: {}]   ;;  %s2650_s5 = inlined_call_operand.vmem [shape: f32[1,128], index: 5, kind: input, shape index: {}]   ;;  %s2651_s6 = inlined_call_operand.hbm [shape: f32[8,128], index: 6, kind: output, shape index: {}]  }
   0x1   :  { %13 = vsyncpa [#allocation6 + $0x1], 0 }
   0x2   :  { %14 = vsyncpa [#allocation9], 0 }
   0x3   :  { %15 = vsyncpa [#allocation12], 0 }
   0x4   :  { %16 = vsyncpa [#allocation7], 0  ;;  %s2149_s21 = smov 0   ;;  %s2151_s22 = smov 0  }
   0x5   :  { %s2153_s23 = smov 0   ;;  %s2155_s24 = smov 0  }
   0x6 LB: > { %s2168_s25 = sadd.s32 4294967295, %s2099_s24   ;;  %p42_p0 = scmp.ne.s32.totalorder %s2091_s22, %s2087_s21  ;;  %s2099_s24 = sphi %s2155_s24, %s2687_s24   ;;  %s2095_s23 = sphi %s2153_s23, %s2686_s23   ;;  %s2091_s22 = sphi %s2151_s22, %s2685_s22   ;;  %s2087_s21 = sphi %s2149_s21, %s2684_s21  }
   0x7   : > { %p2652_p1 = scmp.eq.s32.totalorder %s2168_s25, 0  ;;  %p1522_p2 = scmp.ge.s32.totalorder %s2099_s24, 1 }
   0x8   : > { %p179_p3 = scmp.lt.s32.totalorder %s2099_s24, 3  ;;  %s2101_s28 = smov [#allocation8]  }
   0x9   : > { %p2177_p5 = por %p2652_p1, %p42_p0  ;;  %s191_s29 = sshll.u32 %s2101_s28, 4  ;;  %s2185_s29 = int_to_ptr.vmem [resolvable:$true] %s191_s29 }
   0xa   : > { %p2181_p6 = pnand %p1522_p2, %p179_p3  ;;  %s2102_s7 = smov [#allocation10]  }
   0xb   : > { %s2657_s26 = scalar_select %p2177_p5, 1, 0 }
   0xc   : > { %s2658_s27 = scalar_select %p2181_p6, 1, 0 }
   0xd   : > { %p1676_p7 = pneg %p2181_p6  ;;  %s204_s8 = sshll.u32 %s2102_s7, 4  ;;  %s2195_s8 = int_to_ptr.vmem [resolvable:$true] %s204_s8 }
   0xe   : > { %s2103_s9 = smov [#allocation11]   ;;  %s1913_s13 = scalar_lea.hbm %s2646_s1, 4096 }
   0xf   : > { %p2191_p8 = pnand %p1676_p7, %p2652_p1  ;;  %s2197_s10 = sshll.u32 %s2103_s9, 4  ;;  %s221_s10 = int_to_ptr.vmem [resolvable:$true] %s2197_s10 }
  0x10   : > { %p1914_p9 = scmp.ne.s32.totalorder %s2646_s1, %s1913_s13  ;;  %p1920_p13 = scmp.lt.u32.totalorder %s1913_s13, %s2646_s1 }
  0x11   : > { %p2207_p10 = pneg %p2191_p8 }
  0x13   : > { %p1916_p11 = pnand %p2207_p10, %p1914_p9 }
  0x15   : > { %p1917_p12 = pneg %p1916_p11 }
  0x17   : > { %p1922_p0 = pnand %p1920_p13, %p1917_p12 }
  0x19   : > { %1925 = shalt.err (!%p1922_p0)
}
  0x1a   : > { %s1926_s19 = scalar_lea.vmem %s2185_s29, 4096  ;;  %p1934_p4 = scmp.lt.s32.totalorder %s2185_s29, %s2185_s29 }
  0x1b   : > { %p1927_p2 = scmp.ne.s32.totalorder %s2185_s29, %s1926_s19  ;;  %p1935_p1 = scmp.lt.s32.totalorder %s1926_s19, %s1926_s19 }
  0x1d   : > { %p1929_p3 = pnand %p1927_p2, %p2207_p10  ;;  %p1936_p9 = por %p1935_p1, %p1934_p4 }
  0x1f   : > { %p1930_p7 = pneg %p1929_p3 }
  0x21   : > { %p1937_p11 = pnand %p1936_p9, %p1930_p7 }
  0x23   : > { %1940 = shalt.err (!%p1937_p11)
}
  0x24   : > { %s2104_s20 = smov 256   ;;  %s2105_s21 = smov 16  }
  0x25   : > { %1679 = dma.hbm_to_vmem [thread:$0]  (!%p2191_p8), %s2646_s1, 4096, %s2185_s29, [#allocation9], %s2104_s20, %s2104_s20, %s2105_s21  }
  0x26   : > { %s1941_s12 = scalar_lea.hbm %s2647_s2, 4096 }
  0x27   : > { %p1942_p1 = scmp.ne.s32.totalorder %s2647_s2, %s1941_s12  ;;  %p1948_p13 = scmp.lt.u32.totalorder %s1941_s12, %s2647_s2 }
  0x29   : > { %p1944_p4 = pnand %p1942_p1, %p2207_p10 }
  0x2b   : > { %p1945_p12 = pneg %p1944_p4 }
  0x2d   : > { %p1950_p0 = pnand %p1948_p13, %p1945_p12 }
  0x2f   : > { %1953 = shalt.err (!%p1950_p0)
}
  0x30   : > { %s1954_s29 = scalar_lea.vmem %s2195_s8, 4096  ;;  %p1962_p9 = scmp.lt.s32.totalorder %s2195_s8, %s2195_s8 }
  0x31   : > { %p1955_p2 = scmp.ne.s32.totalorder %s2195_s8, %s1954_s29  ;;  %p1963_p11 = scmp.lt.s32.totalorder %s1954_s29, %s1954_s29 }
  0x33   : > { %p1957_p3 = pnand %p1955_p2, %p2207_p10  ;;  %p1964_p1 = por %p1963_p11, %p1962_p9 }
  0x35   : > { %p1958_p7 = pneg %p1957_p3 }
  0x37   : > { %p1965_p4 = pnand %p1964_p1, %p1958_p7 }
  0x39   : > { %1968 = shalt.err (!%p1965_p4)
}
  0x3a   : > { %1682 = dma.hbm_to_vmem [thread:$0]  (!%p2191_p8), %s2647_s2, 4096, %s2195_s8, [#allocation9], %s2104_s20, %s2104_s20, %s2105_s21  }
  0x3b   : > { %s1969_s9 = scalar_lea.hbm %s2649_s4, 1024 }
  0x3c   : > { %p1970_p12 = scmp.ne.s32.totalorder %s2649_s4, %s1969_s9  ;;  %p1976_p2 = scmp.lt.u32.totalorder %s1969_s9, %s2649_s4 }
  0x3e   : > { %p1972_p13 = pnand %p1970_p12, %p2207_p10 }
  0x40   : > { %p1973_p0 = pneg %p1972_p13 }
  0x42   : > { %p1978_p3 = pnand %p1976_p2, %p1973_p0 }
  0x44   : > { %1981 = shalt.err (!%p1978_p3)
}
  0x45   : > { %s1982_s15 = scalar_lea.vmem %s221_s10, 1024  ;;  %p1990_p1 = scmp.lt.s32.totalorder %s221_s10, %s221_s10 }
  0x46   : > { %p1983_p7 = scmp.ne.s32.totalorder %s221_s10, %s1982_s15  ;;  %p1991_p4 = scmp.lt.s32.totalorder %s1982_s15, %s1982_s15 }
  0x48   : > { %p1985_p9 = pnand %p1983_p7, %p2207_p10  ;;  %p1992_p5 = por %p1991_p4, %p1990_p1 }
  0x4a   : > { %p1986_p11 = pneg %p1985_p9 }
  0x4c   : > { %p1993_p6 = pnand %p1992_p5, %p1986_p11 }
  0x4e   : > { %1996 = shalt.err (!%p1993_p6)
}
  0x4f   : > { %s2106_s8 = smov 64   ;;  %s2107_s16 = smov 4  }
  0x50   : > { %1685 = dma.hbm_to_vmem [thread:$0]  (!%p2191_p8), %s2649_s4, 1024, %s221_s10, [#allocation12], %s2106_s8, %s2106_s8, %s2107_s16  }
  0x51   : > { %s2274_s17 = sadd.s32 1, %s2099_s24   ;;  %s29_s18 = sadd.s32 1, %s2095_s23 }
  0x52   : > { %s26_s29 = ssub.s32 %s2099_s24, %s2274_s17  ;;  %p36_p6 = scmp.ne.s32.totalorder %s2095_s23, %s2091_s22 }
  0x53   : > { %p27_p5 = scmp.eq.s32.totalorder %s26_s29, 0  ;;  %p37_p10 = scmp.eq.s32.totalorder %s2099_s24, 0 }
  0x54   : > { %p1693_p12 = scmp.lt.s32.totalorder %s2099_s24, 2  ;;  %s237_s30 = sand.u32 1, %s2095_s23  }
  0x55   : > { %s2284_s19 = scalar_select %p27_p5, %s2095_s23, %s29_s18  }
  0x56   : > { %p38_p13 = por %p37_p10, %p36_p6  ;;  %s1527_s28 = sshll.u32 %s237_s30, 4 }
  0x57   : > { %s1628_s7 = sshll.u32 %s2099_s24, 8  ;;  %s241_s10 = scalar_lea.vmem [#allocation5], %s1527_s28 }
  0x58   : > { %s2291_s12 = scalar_lea.hbm %s2645_s0, %s1628_s7  ;;  %s248_s13 = sshll.u32 %s241_s10, 4  ;;  %s2293_s13 = int_to_ptr.vmem [resolvable:$true] %s248_s13 }
  0x59   : > { %p2295_p8 = pnand %p1693_p12, %p38_p13  ;;  %s2299_s24 = scalar_lea.sflag [#allocation6], %s237_s30 }
  0x5a   : > { %s1997_s15 = scalar_lea.hbm %s2291_s12, 256  ;;  %s2002_s29 = scalar_lea.hbm %s2645_s0, 512 }
  0x5b   : > { %p1998_p0 = scmp.ne.s32.totalorder %s2291_s12, %s1997_s15  ;;  %p1999_p2 = pneg %p2295_p8 }
  0x5c   : > { %p2003_p9 = scmp.lt.u32.totalorder %s2291_s12, %s2645_s0  ;;  %p2004_p11 = scmp.lt.u32.totalorder %s2002_s29, %s1997_s15 }
  0x5d   : > { %p2000_p3 = pnand %p1999_p2, %p1998_p0  ;;  %p2006_p4 = scmp.lt.u32.totalorder %s1997_s15, %s2291_s12 }
  0x5e   : > { %p2005_p1 = por %p2004_p11, %p2003_p9 }
  0x5f   : > { %p2001_p7 = pneg %p2000_p3 }
  0x60   : > { %p2007_p5 = por %p2006_p4, %p2005_p1 }
  0x62   : > { %p2008_p6 = pnand %p2007_p5, %p2001_p7 }
  0x64   : > { %2011 = shalt.err (!%p2008_p6)
}
  0x65   : > { %s2012_s30 = scalar_lea.vmem %s2293_s13, 256  ;;  %s2108_s7 = smov [#allocation5]  }
  0x66   : > { %p2013_p10 = scmp.ne.s32.totalorder %s2293_s13, %s2012_s30  ;;  %s2017_s9 = sshll.u32 %s2108_s7, 4  ;;  %s2018_s9 = int_to_ptr.vmem [resolvable:$false] %s2017_s9 }
  0x67   : > { %s2019_s11 = scalar_lea.vmem %s2018_s9, 512  ;;  %p2020_p0 = scmp.lt.s32.totalorder %s2293_s13, %s2018_s9 }
  0x68   : > { %p2015_p12 = pnand %p2013_p10, %p1999_p2  ;;  %p2021_p3 = scmp.lt.s32.totalorder %s2019_s11, %s2012_s30 }
  0x6a   : > { %p2016_p13 = pneg %p2015_p12  ;;  %p2022_p9 = por %p2021_p3, %p2020_p0 }
  0x6c   : > { %p2023_p11 = pnand %p2022_p9, %p2016_p13 }
  0x6e   : > { %2026 = shalt.err (!%p2023_p11)
}
  0x6f   : > { %1689 = dma.hbm_to_vmem [thread:$0]  (!%p2295_p8), %s2291_s12, 256, %s2293_s13, %s2299_s24, %s2106_s8, %s2106_s8, %s2107_s16  }
  0x70   : > { %p2662_p2 = scmp.ne.s32.totalorder %s2658_s27, 0 }
  0x72   : > { %260 = sbr.rel (%p2662_p2) target bundleno = 1486 (0x5ce), region = 44 }
  0x79   : > { %s262_s10 = sand.u32 1, %s2091_s22   ;;  %p2663_p7 = scmp.ne.s32.totalorder %s2657_s26, 0 }
  0x7a   : > { %s2333_s15 = sshll.u32 %s262_s10, 4  ;;  %s263_s20 = scalar_lea.sflag [#allocation6], %s262_s10 }
  0x7b   : > { %s266_s21 = scalar_lea.vmem [#allocation5], %s2333_s15 }
  0x7c   : > { %2070 = dma.done.wait (%p2663_p7), %s263_s20, 256  }
  0x7d   : > { %2072 = vsyncadd (%p2663_p7), %s263_s20, 4294967040  ;;  %p2664_p1 = scmp.eq.s32.totalorder %s2168_s25, 0 }
  0x7f   : > { %2074 = dma.done.wait (%p2664_p1), [#allocation9], 8192   ;;  %p2665_p8 = pmov %p2664_p1 }
  0x80   : > { %p2666_p4 = pmov %p2664_p1 }
  0x81   : > { %2076 = vsyncadd (%p2665_p8), [#allocation9], 4294959104 }
  0x82   : > { %2078 = dma.done.wait (%p2666_p4), [#allocation12], 1024   ;;  %p2667_p5 = pmov %p2664_p1 }
  0x83   : > { %p2668_p6 = scmp.ne.s32.totalorder %s2168_s25, 0 }
  0x84   : > { %2080 = vsyncadd (%p2667_p5), [#allocation12], 4294966272  ;;  %v2109_v0 = vmov (!%p2668_p6), 0.0  }
  0x85   : > { %307 = sbr.rel (%p2668_p6) target bundleno = 140 (0x8c), region = 64  ;;  %308 = vst [vmem:[#allocation2] sm:$0xff] (!%p2668_p6), %v2109_v0  ;;  %309 = vst [vmem:[#allocation3] sm:$0xff] (!%p2668_p6), %v2109_v0 }
  0x8c PF: > { %v1743_v1 = vld [vmem:[#allocation8 + $0x4] ss:$16 sps:$4 sm:$0xff]   ;;  %v1745_v2 = vld [vmem:[#allocation8 + $0xc] ss:$16 sps:$4 sm:$0xff]   ;;  %v2655_v3 = vmov 0   ;;  %p1614_p10 = scmp.ne.s32.totalorder %s2168_s25, 1 }
  0x8d   : > { %572 = vmatprep.mubr.bf16.mxu0 %v2655_v3  ;;  %625 = vmatprep.mubr.bf16.mxu1 %v2655_v3  ;;  %v1747_v4 = vld [vmem:[#allocation8] ss:$16 sps:$4 sm:$0xff]   ;;  %v1748_v5 = vld [vmem:[#allocation8 + $0x8] ss:$16 sps:$4 sm:$0xff]   ;;  %v1749_v6 = vld [vmem:[#allocation8 + $0x24] ss:$16 sps:$4 sm:$0xff]  }
  0x8e   : > { %540 = vmatprep.subr.bf16.mxu0 %v1743_v1  ;;  %593 = vmatprep.subr.bf16.mxu1 %v1745_v2  ;;  %v1751_v7 = vld [vmem:[#allocation8 + $0x2c] ss:$16 sps:$4 sm:$0xff]   ;;  %v1753_v8 = vld [vmem:[#allocation8 + $0x20] ss:$16 sps:$4 sm:$0xff]   ;;  %v1754_v9 = vld [vmem:[#allocation8 + $0x28] ss:$16 sps:$4 sm:$0xff]  }
  0x8f   : > { %541 = vmatpush1.bf16.msra.mxu0 %v1747_v4  ;;  %594 = vmatpush1.bf16.msra.mxu1 %v1748_v5  ;;  %v1755_v10 = vld [vmem:[#allocation8 + $0x44] ss:$16 sps:$4 sm:$0xff]   ;;  %v1757_v11 = vld [vmem:[#allocation8 + $0x4c] ss:$16 sps:$4 sm:$0xff]   ;;  %v1759_v12 = vld [vmem:[#allocation8 + $0x40] ss:$16 sps:$4 sm:$0xff]  }
  0x90   : > { %542 = vmatprep.subr.bf16.mxu0 %v1749_v6  ;;  %595 = vmatprep.subr.bf16.mxu1 %v1751_v7  ;;  %v1760_v13 = vld [vmem:[#allocation8 + $0x48] ss:$16 sps:$4 sm:$0xff]   ;;  %v1761_v14 = vld [vmem:[#allocation8 + $0x64] ss:$16 sps:$4 sm:$0xff]   ;;  %v1763_v15 = vld [vmem:[#allocation8 + $0x6c] ss:$16 sps:$4 sm:$0xff]   ;;  %v348_v7 = vlaneseq }
  0x91   : > { %v1765_v16 = vld [vmem:[#allocation8 + $0x60] ss:$16 sps:$4 sm:$0xff]   ;;  %v1766_v17 = vld [vmem:[#allocation8 + $0x68] ss:$16 sps:$4 sm:$0xff]   ;;  %v1767_v18 = vld [vmem:[#allocation8 + $0x84] ss:$16 sps:$4 sm:$0xff]  }
  0x92   : > { %v1769_v19 = vld [vmem:[#allocation8 + $0x8c] ss:$16 sps:$4 sm:$0xff]   ;;  %v1771_v20 = vld [vmem:[#allocation8 + $0x80] ss:$16 sps:$4 sm:$0xff]   ;;  %v1772_v21 = vld [vmem:[#allocation8 + $0x88] ss:$16 sps:$4 sm:$0xff]  }
  0x93   : > { %543 = vmatpush1.bf16.msra.mxu0 %v1753_v8  ;;  %596 = vmatpush1.bf16.msra.mxu1 %v1754_v9  ;;  %v1773_v22 = vld [vmem:[#allocation8 + $0xa4] ss:$16 sps:$4 sm:$0xff]   ;;  %v1775_v23 = vld [vmem:[#allocation8 + $0xac] ss:$16 sps:$4 sm:$0xff]   ;;  %v1777_v24 = vld [vmem:[#allocation8 + $0xa0] ss:$16 sps:$4 sm:$0xff]  }
  0x94   : > { %544 = vmatprep.subr.bf16.mxu0 %v1755_v10  ;;  %597 = vmatprep.subr.bf16.mxu1 %v1757_v11  ;;  %v1778_v25 = vld [vmem:[#allocation8 + $0xa8] ss:$16 sps:$4 sm:$0xff]   ;;  %v1779_v26 = vld [vmem:[#allocation8 + $0xc4] ss:$16 sps:$4 sm:$0xff]   ;;  %v1781_v27 = vld [vmem:[#allocation8 + $0xcc] ss:$16 sps:$4 sm:$0xff]  }
  0x95   : > { %v1783_v28 = vld [vmem:[#allocation8 + $0xc0] ss:$16 sps:$4 sm:$0xff]   ;;  %v1784_v29 = vld [vmem:[#allocation8 + $0xc8] ss:$16 sps:$4 sm:$0xff]   ;;  %v1785_v30 = vld [vmem:[#allocation8 + $0xe4] ss:$16 sps:$4 sm:$0xff]  }
  0x96   : > { %v1787_v31 = vld [vmem:[#allocation8 + $0xec] ss:$16 sps:$4 sm:$0xff]   ;;  %v1789_v32 = vld [vmem:[#allocation8 + $0xe0] ss:$16 sps:$4 sm:$0xff]   ;;  %v1790_v33 = vld [vmem:[#allocation8 + $0xe8] ss:$16 sps:$4 sm:$0xff]  }
  0x97   : > { %545 = vmatpush1.bf16.msra.mxu0 %v1759_v12  ;;  %598 = vmatpush1.bf16.msra.mxu1 %v1760_v13  ;;  %v2352_v34 = vld [vmem:[#allocation10 + $0x4] ss:$16 sps:$4 sm:$0xff]   ;;  %v2354_v35 = vld [vmem:[#allocation10 + $0xc] ss:$16 sps:$4 sm:$0xff]   ;;  %v2358_v37 = vld [vmem:[#allocation10] ss:$16 sps:$4 sm:$0xff]  }
  0x98   : > { %546 = vmatprep.subr.bf16.mxu0 %v1761_v14  ;;  %599 = vmatprep.subr.bf16.mxu1 %v1763_v15  ;;  %v1791_v36 = vld [vmem:[%s266_s21] sm:$0xff]   ;;  %v2360_v38 = vld [vmem:[#allocation10 + $0x8] ss:$16 sps:$4 sm:$0xff]   ;;  %v2366_v40 = vld [vmem:[#allocation10 + $0x2c] ss:$16 sps:$4 sm:$0xff]   ;;  %v349_v8 = vshrl.u32 %v348_v7, 7 }
  0x99   : > { %v2362_v39 = vld [vmem:[#allocation10 + $0x24] ss:$16 sps:$4 sm:$0xff]   ;;  %v2368_v41 = vld [vmem:[#allocation10 + $0x20] ss:$16 sps:$4 sm:$0xff]   ;;  %v2370_v42 = vld [vmem:[#allocation10 + $0x28] ss:$16 sps:$4 sm:$0xff]  }
  0x9a   : > { %v2374_v43 = vld [vmem:[#allocation10 + $0x44] ss:$16 sps:$4 sm:$0xff]   ;;  %v2378_v44 = vld [vmem:[#allocation10 + $0x4c] ss:$16 sps:$4 sm:$0xff]   ;;  %v2380_v45 = vld [vmem:[#allocation10 + $0x40] ss:$16 sps:$4 sm:$0xff]  }
  0x9b   : > { %547 = vmatpush1.bf16.msra.mxu0 %v1765_v16  ;;  %600 = vmatpush1.bf16.msra.mxu1 %v1766_v17  ;;  %v1826_v46 = vld [vmem:[%s266_s21 + $0x8] sm:$0xff]   ;;  %v2392_v48 = vld [vmem:[#allocation10 + $0x64] ss:$16 sps:$4 sm:$0xff]   ;;  %v2398_v50 = vld [vmem:[#allocation10 + $0x60] ss:$16 sps:$4 sm:$0xff]   ;;  %v350_v9 = vsub.s32 0, %v349_v8 }
  0x9c   : > { %548 = vmatprep.subr.bf16.mxu0 %v1767_v18  ;;  %601 = vmatprep.subr.bf16.mxu1 %v1769_v19  ;;  %v2388_v47 = vld [vmem:[#allocation10 + $0x48] ss:$16 sps:$4 sm:$0xff]   ;;  %v2394_v49 = vld [vmem:[#allocation10 + $0x6c] ss:$16 sps:$4 sm:$0xff]   ;;  %v2404_v52 = vld [vmem:[#allocation10 + $0x84] ss:$16 sps:$4 sm:$0xff]  }
  0x9d   : > { %v2400_v51 = vld [vmem:[#allocation10 + $0x68] ss:$16 sps:$4 sm:$0xff]   ;;  %v2406_v53 = vld [vmem:[#allocation10 + $0x8c] ss:$16 sps:$4 sm:$0xff]   ;;  %v2412_v54 = vld [vmem:[#allocation10 + $0x80] ss:$16 sps:$4 sm:$0xff]  }
  0x9e   : > { %v2414_v55 = vld [vmem:[#allocation10 + $0x88] ss:$16 sps:$4 sm:$0xff]   ;;  %v2418_v56 = vld [vmem:[#allocation10 + $0xa4] ss:$16 sps:$4 sm:$0xff]   ;;  %v2420_v57 = vld [vmem:[#allocation10 + $0xac] ss:$16 sps:$4 sm:$0xff]  }
  0x9f   : > { %549 = vmatpush1.bf16.msra.mxu0 %v1771_v20  ;;  %602 = vmatpush1.bf16.msra.mxu1 %v1772_v21  ;;  %v2424_v58 = vld [vmem:[#allocation10 + $0xa0] ss:$16 sps:$4 sm:$0xff]   ;;  %v2426_v59 = vld [vmem:[#allocation10 + $0xa8] ss:$16 sps:$4 sm:$0xff]   ;;  %v2430_v60 = vld [vmem:[#allocation10 + $0xc4] ss:$16 sps:$4 sm:$0xff]  }
  0xa0   : > { %550 = vmatprep.subr.bf16.mxu0 %v1773_v22  ;;  %603 = vmatprep.subr.bf16.mxu1 %v1775_v23  ;;  %v2432_v61 = vld [vmem:[#allocation10 + $0xcc] ss:$16 sps:$4 sm:$0xff]   ;;  %v2436_v62 = vld [vmem:[#allocation10 + $0xc0] ss:$16 sps:$4 sm:$0xff]   ;;  %v2438_v63 = vld [vmem:[#allocation10 + $0xc8] ss:$16 sps:$4 sm:$0xff]  }
  0xa1   : > { %v2442_v0 = vld [vmem:[#allocation10 + $0xe4] ss:$16 sps:$4 sm:$0xff]   ;;  %v2444_v1 = vld [vmem:[#allocation10 + $0xec] ss:$16 sps:$4 sm:$0xff]   ;;  %v2448_v2 = vld [vmem:[#allocation10 + $0xe0] ss:$16 sps:$4 sm:$0xff]  }
  0xa2   : > { %v2450_v4 = vld [vmem:[#allocation10 + $0xe8] ss:$16 sps:$4 sm:$0xff]   ;;  %v694_v5 = vld [vmem:[#allocation2] sm:$0xff]  ;;  %v358_v10 = vsub.s32 2, %v349_v8  ;;  %v362_v12 = vsub.s32 3, %v349_v8  ;;  %v354_v13 = vsub.s32 1, %v349_v8 }
  0xa3   : > { %551 = vmatpush1.bf16.msra.mxu0 %v1777_v24  ;;  %604 = vmatpush1.bf16.msra.mxu1 %v1778_v25  ;;  %v700_v6 = vpack.c.bf16 %v694_v5, %v694_v5  ;;  %v346_v11 = vld [vmem:[%s2648_s3] sm:$0xf]  ;;  %vm2112_vm0 = vmmov (!%p1614_p10), 0  }
  0xa4   : > { %552 = vmatprep.subr.bf16.mxu0 %v1779_v26  ;;  %605 = vmatprep.subr.bf16.mxu1 %v1781_v27  ;;  %v351_v14 = vrot.slane %v346_v11, %v350_v9  ;;  %v359_v15 = vrot.slane %v346_v11, %v358_v10  ;;  %v363_v18 = vrot.slane %v346_v11, %v362_v12 }
  0xa5   : > { %v355_v21 = vrot.slane %v346_v11, %v354_v13 }
  0xa7   : > { %553 = vmatpush1.bf16.msra.mxu0 %v1783_v28  ;;  %606 = vmatpush1.bf16.msra.mxu1 %v1784_v29 }
  0xa8   : > { %554 = vmatprep.subr.bf16.mxu0 %v1785_v30  ;;  %607 = vmatprep.subr.bf16.mxu1 %v1787_v31 }
  0xab   : > { %555 = vmatpush1.bf16.msra.mxu0 %v1789_v32  ;;  %608 = vmatpush1.bf16.msra.mxu1 %v1790_v33 }
  0xac   : > { %861 = vmatprep.subr.bf16.mxu0 %v2352_v34  ;;  %902 = vmatprep.subr.bf16.mxu1 %v2354_v35 }
  0xae   : > { %573 = vmatmul.mubr.bf16.vlgmr.msra.gmra.mrb[0].mxu0 %v1791_v36  ;;  %626 = vmatmul.mubr.bf16.vlgmr.msra.gmra.mrb[0].mxu1 %v1791_v36 }
  0xaf   : > { %862 = vmatpush1.bf16.msra.mxu0 %v2358_v37  ;;  %903 = vmatpush1.bf16.msra.mxu1 %v2360_v38 }
  0xb0   : > { %863 = vmatprep.subr.bf16.mxu0 %v2362_v39  ;;  %904 = vmatprep.subr.bf16.mxu1 %v2366_v40 }
  0xb1   : > { %582 = vmatprep.mubr.bf16.mxu0 %v2655_v3  ;;  %635 = vmatprep.mubr.bf16.mxu1 %v2655_v3 }
  0xb3   : > { %864 = vmatpush1.bf16.msra.mxu0 %v2368_v41  ;;  %905 = vmatpush1.bf16.msra.mxu1 %v2370_v42 }
  0xb4   : > { %865 = vmatprep.subr.bf16.mxu0 %v2374_v43  ;;  %906 = vmatprep.subr.bf16.mxu1 %v2378_v44 }
  0xb6   : > { %583 = vmatmul.mubr.bf16.gmra.mrb[4].mxu0 %v1826_v46  ;;  %636 = vmatmul.mubr.bf16.gmra.mrb[4].mxu1 %v1826_v46 }
  0xb7   : > { %866 = vmatpush1.bf16.msra.mxu0 %v2380_v45  ;;  %907 = vmatpush1.bf16.msra.mxu1 %v2388_v47 }
  0xb8   : > { %867 = vmatprep.subr.bf16.mxu0 %v2392_v48  ;;  %908 = vmatprep.subr.bf16.mxu1 %v2394_v49 }
  0xb9   : > { %893 = vmatprep.mubr.bf16.mxu0 %v2655_v3  ;;  %934 = vmatprep.mubr.bf16.mxu1 %v2655_v3 }
  0xbb   : > { %868 = vmatpush1.bf16.msra.mxu0 %v2398_v50  ;;  %909 = vmatpush1.bf16.msra.mxu1 %v2400_v51 }
  0xbc   : > { %869 = vmatprep.subr.bf16.mxu0 %v2404_v52  ;;  %910 = vmatprep.subr.bf16.mxu1 %v2406_v53 }
  0xbf   : > { %870 = vmatpush1.bf16.msra.mxu0 %v2412_v54  ;;  %911 = vmatpush1.bf16.msra.mxu1 %v2414_v55 }
  0xc0   : > { %871 = vmatprep.subr.bf16.mxu0 %v2418_v56  ;;  %912 = vmatprep.subr.bf16.mxu1 %v2420_v57 }
  0xc3   : > { %872 = vmatpush1.bf16.msra.mxu0 %v2424_v58  ;;  %913 = vmatpush1.bf16.msra.mxu1 %v2426_v59 }
  0xc4   : > { %873 = vmatprep.subr.bf16.mxu0 %v2430_v60  ;;  %914 = vmatprep.subr.bf16.mxu1 %v2432_v61 }
  0xc7   : > { %874 = vmatpush1.bf16.msra.mxu0 %v2436_v62  ;;  %915 = vmatpush1.bf16.msra.mxu1 %v2438_v63 }
  0xc8   : > { %875 = vmatprep.subr.bf16.mxu0 %v2442_v0  ;;  %916 = vmatprep.subr.bf16.mxu1 %v2444_v1 }
  0xcb   : > { %876 = vmatpush1.bf16.msra.mxu0 %v2448_v2  ;;  %917 = vmatpush1.bf16.msra.mxu1 %v2450_v4 }
  0xcc   : > { %976 = vmatprep.subr.bf16.mxu0 %v2352_v34  ;;  %1017 = vmatprep.subr.bf16.mxu1 %v2354_v35 }
  0xce   : > { %894 = vmatmul.mubr.bf16.vlgmr.msra.gmra.mrb[8].mxu0 %v700_v6  ;;  %935 = vmatmul.mubr.bf16.vlgmr.msra.gmra.mrb[8].mxu1 %v700_v6 }
  0xcf   : > { %977 = vmatpush1.bf16.msra.mxu0 %v2358_v37  ;;  %1018 = vmatpush1.bf16.msra.mxu1 %v2360_v38 }
  0xd0   : > { %978 = vmatprep.subr.bf16.mxu0 %v2362_v39  ;;  %1019 = vmatprep.subr.bf16.mxu1 %v2366_v40 }
  0xd1   : > { %1008 = vmatprep.mubr.bf16.mxu0 %v2655_v3  ;;  %1049 = vmatprep.mubr.bf16.mxu1 %v2655_v3 }
  0xd3   : > { %979 = vmatpush1.bf16.msra.mxu0 %v2368_v41  ;;  %1020 = vmatpush1.bf16.msra.mxu1 %v2370_v42 }
  0xd4   : > { %980 = vmatprep.subr.bf16.mxu0 %v2374_v43  ;;  %1021 = vmatprep.subr.bf16.mxu1 %v2378_v44 }
  0xd7   : > { %981 = vmatpush1.bf16.msra.mxu0 %v2380_v45  ;;  %1022 = vmatpush1.bf16.msra.mxu1 %v2388_v47 }
  0xd8   : > { %982 = vmatprep.subr.bf16.mxu0 %v2392_v48  ;;  %1023 = vmatprep.subr.bf16.mxu1 %v2394_v49 }
  0xdb   : > { %983 = vmatpush1.bf16.msra.mxu0 %v2398_v50  ;;  %1024 = vmatpush1.bf16.msra.mxu1 %v2400_v51 }
  0xdc   : > { %984 = vmatprep.subr.bf16.mxu0 %v2404_v52  ;;  %1025 = vmatprep.subr.bf16.mxu1 %v2406_v53 }
  0xdf   : > { %985 = vmatpush1.bf16.msra.mxu0 %v2412_v54  ;;  %1026 = vmatpush1.bf16.msra.mxu1 %v2414_v55 }
  0xe0   : > { %986 = vmatprep.subr.bf16.mxu0 %v2418_v56  ;;  %1027 = vmatprep.subr.bf16.mxu1 %v2420_v57 }
  0xe3   : > { %987 = vmatpush1.bf16.msra.mxu0 %v2424_v58  ;;  %1028 = vmatpush1.bf16.msra.mxu1 %v2426_v59 }
  0xe4   : > { %988 = vmatprep.subr.bf16.mxu0 %v2430_v60  ;;  %1029 = vmatprep.subr.bf16.mxu1 %v2432_v61 }
  0xe7   : > { %989 = vmatpush1.bf16.msra.mxu0 %v2436_v62  ;;  %1030 = vmatpush1.bf16.msra.mxu1 %v2438_v63 }
  0xe8   : > { %990 = vmatprep.subr.bf16.mxu0 %v2442_v0  ;;  %1031 = vmatprep.subr.bf16.mxu1 %v2444_v1 }
  0xeb   : > { %991 = vmatpush1.bf16.msra.mxu0 %v2448_v2  ;;  %1032 = vmatpush1.bf16.msra.mxu1 %v2450_v4 }
  0xec   : > { %1091 = vmatprep.subr.bf16.mxu0 %v2352_v34  ;;  %1132 = vmatprep.subr.bf16.mxu1 %v2354_v35 }
 0x181   : > { %v574_v16 = vpop.f32.mrb[0].mxu0  ;;  %v627_v17 = vpop.f32.mrb[0].mxu1 }
 0x182   : > { %v576_v19 = vpop.f32.mrb[1].mxu0  ;;  %v629_v20 = vpop.f32.mrb[1].mxu1 }
 0x183   : > { %v578_v22 = vpop.f32.mrb[2].mxu0  ;;  %v631_v23 = vpop.f32.mrb[2].mxu1 }
 0x184   : > { %v2495_v24 = vadd.f32 %v578_v22, %v351_v14  ;;  %v580_v25 = vpop.f32.mrb[3].mxu0  ;;  %v2497_v26 = vadd.f32 %v631_v23, %v359_v15  ;;  %v633_v27 = vpop.f32.mrb[3].mxu1  ;;  %v575_v23 = vadd.f32 %v574_v16, %v351_v14 }
 0x185   : > { %v2499_v28 = vadd.f32 %v580_v25, %v355_v21  ;;  %v2501_v29 = vadd.f32 %v633_v27, %v363_v18  ;;  %v628_v25 = vadd.f32 %v627_v17, %v359_v15  ;;  %v577_v27 = vadd.f32 %v576_v19, %v355_v21 }
 0x189   : > { %v584_v30 = vpop.f32.mrb[4].mxu0  ;;  %v637_v31 = vpop.f32.mrb[4].mxu1 }
 0x18a   : > { %v2503_v32 = vadd.f32 %v584_v30, %v351_v14  ;;  %v586_v33 = vpop.f32.mrb[5].mxu0  ;;  %v2505_v36 = vadd.f32 %v637_v31, %v359_v15  ;;  %v639_v46 = vpop.f32.mrb[5].mxu1  ;;  %v630_v30 = vadd.f32 %v629_v20, %v363_v18 }
 0x18b   : > { %v2507_v5 = vadd.f32 %v586_v33, %v355_v21  ;;  %v588_v6 = vpop.f32.mrb[6].mxu0  ;;  %v2509_v7 = vadd.f32 %v639_v46, %v363_v18  ;;  %v641_v8 = vpop.f32.mrb[6].mxu1 }
 0x18c   : > { %2669 = vst [vmem:[#allocation18_spill] sm:$0xff] %v2503_v32  ;;  %2670 = vst [vmem:[#allocation19_spill] sm:$0xff] %v2505_v36  ;;  %v2511_v9 = vadd.f32 %v588_v6, %v351_v14  ;;  %v590_v10 = vpop.f32.mrb[7].mxu0  ;;  %v2513_v11 = vadd.f32 %v641_v8, %v359_v15  ;;  %v643_v12 = vpop.f32.mrb[7].mxu1 }
 0x18d   : > { %2671 = vst [vmem:[#allocation20_spill] sm:$0xff] %v2507_v5  ;;  %2672 = vst [vmem:[#allocation21_spill] sm:$0xff] %v2509_v7  ;;  %v2515_v13 = vadd.f32 %v590_v10, %v355_v21  ;;  %v2517_v22 = vadd.f32 %v643_v12, %v363_v18  ;;  %v695_v21 = vld [vmem:[#allocation3] sm:$0xff] }
 0x18e   : > { %2673 = vst [vmem:[#allocation22_spill] sm:$0xff] %v2511_v9  ;;  %2674 = vst [vmem:[#allocation23_spill] sm:$0xff] %v2513_v11 }
 0x18f   : > { %2675 = vst [vmem:[#allocation24_spill] sm:$0xff] %v2515_v13 }
 0x1a1   : > { %v895_v31 = vpop.f32.mrb[8].mxu0  ;;  %v936_v33 = vpop.f32.mrb[8].mxu1 }
 0x1a2   : > { %v943_v3 = vadd.f32 %v895_v31, %v575_v23  ;;  %v945_v46 = vadd.f32 %v936_v33, %v628_v25  ;;  %v897_v7 = vpop.f32.mrb[9].mxu0  ;;  %v938_v5 = vpop.f32.mrb[9].mxu1  ;;  %v2676_v25 = vmov 0  }
 0x1a3   : > { %v944_v6 = vadd.f32 %v897_v7, %v577_v27  ;;  %v946_v9 = vadd.f32 %v938_v5, %v630_v30  ;;  %v899_v36 = vpop.f32.mrb[10].mxu0  ;;  %v940_v8 = vpop.f32.mrb[10].mxu1 }
 0x1a4   : > { %v1602_v11 = vmul.f32 -1.442695, %v943_v3  ;;  %v900_v32 = vpop.f32.mrb[11].mxu0  ;;  %v941_v10 = vpop.f32.mrb[11].mxu1 }
 0x1a5   : > { %v1603_v13 = vmul.f32 -1.442695, %v944_v6  ;;  %v1604_v14 = vmul.f32 -1.442695, %v946_v9 }
 0x1a6   : > { %1841 = vpow2.f32 %v1602_v11 }
 0x1a7   : > { %1843 = vpow2.f32 %v1603_v13 }
 0x1a8   : > { %1845 = vpow2.f32 %v1604_v14 }
 0x1a9   : > { %1847 = vtanh.f32 %v945_v46 }
 0x1b0   : > { %v1842_v15 = vpop.eup %1841 }
 0x1b1   : > { %v1844_v16 = vpop.eup %1843  ;;  %v950_v17 = vadd.f32 1.0, %v1842_v15 }
 0x1b2   : > { %v956_v18 = vadd.f32 1.0, %v1844_v16  ;;  %v1846_v19 = vpop.eup %1845 }
 0x1b3   : > { %1849 = vrcp.f32 %v950_v17  ;;  %v1848_v20 = vpop.eup %1847  ;;  %v963_v32 = vadd.f32 1.0, %v1846_v19 }
 0x1b4   : > { %1851 = vrcp.f32 %v956_v18 }
 0x1b5   : > { %1853 = vrcp.f32 %v963_v32 }
 0x1bd   : > { %v1850_v36 = vpop.eup %1849 }
 0x1be   : > { %v1852_v5 = vpop.eup %1851  ;;  %v967_v3 = vmul.f32 %v1850_v36, %v1848_v20 }
 0x1bf   : > { %v966_v7 = vmul.f32 %v1852_v5, %v695_v21  ;;  %v1854_v9 = vpop.eup %1853 }
 0x1c1   : > { %v2519_v12 = vadd.f32 %v967_v3, %v966_v7 }
 0x1c3   : > { %1855 = vtanh.f32 %v2519_v12 }
 0x1cd   : > { %v1856_v11 = vpop.eup %1855 }
 0x1ce   : > { %v970_v13 = vmul.f32 %v1856_v11, %v1854_v9 }
 0x1d0   : > { %v975_v23 = vpack.c.bf16 %v970_v13, %v970_v13 }
 0x1d2   : > { %1009 = vmatmul.mubr.bf16.vlgmr.msra.gmra.mrb[12].mxu0 %v975_v23  ;;  %1050 = vmatmul.mubr.bf16.vlgmr.msra.gmra.mrb[12].mxu1 %v975_v23 }
 0x1d3   : > { %1092 = vmatpush1.bf16.msra.mxu0 %v2358_v37  ;;  %1133 = vmatpush1.bf16.msra.mxu1 %v2360_v38 }
 0x1d4   : > { %1093 = vmatprep.subr.bf16.mxu0 %v2362_v39  ;;  %1134 = vmatprep.subr.bf16.mxu1 %v2366_v40 }
 0x1d5   : > { %1123 = vmatprep.mubr.bf16.mxu0 %v2676_v25  ;;  %1164 = vmatprep.mubr.bf16.mxu1 %v2676_v25 }
 0x1d7   : > { %1094 = vmatpush1.bf16.msra.mxu0 %v2368_v41  ;;  %1135 = vmatpush1.bf16.msra.mxu1 %v2370_v42 }
 0x1d8   : > { %1095 = vmatprep.subr.bf16.mxu0 %v2374_v43  ;;  %1136 = vmatprep.subr.bf16.mxu1 %v2378_v44 }
 0x1db   : > { %1096 = vmatpush1.bf16.msra.mxu0 %v2380_v45  ;;  %1137 = vmatpush1.bf16.msra.mxu1 %v2388_v47 }
 0x1dc   : > { %1097 = vmatprep.subr.bf16.mxu0 %v2392_v48  ;;  %1138 = vmatprep.subr.bf16.mxu1 %v2394_v49 }
 0x1df   : > { %1098 = vmatpush1.bf16.msra.mxu0 %v2398_v50  ;;  %1139 = vmatpush1.bf16.msra.mxu1 %v2400_v51 }
 0x1e0   : > { %1099 = vmatprep.subr.bf16.mxu0 %v2404_v52  ;;  %1140 = vmatprep.subr.bf16.mxu1 %v2406_v53 }
 0x1e3   : > { %1100 = vmatpush1.bf16.msra.mxu0 %v2412_v54  ;;  %1141 = vmatpush1.bf16.msra.mxu1 %v2414_v55 }
 0x1e4   : > { %1101 = vmatprep.subr.bf16.mxu0 %v2418_v56  ;;  %1142 = vmatprep.subr.bf16.mxu1 %v2420_v57 }
 0x1e7   : > { %1102 = vmatpush1.bf16.msra.mxu0 %v2424_v58  ;;  %1143 = vmatpush1.bf16.msra.mxu1 %v2426_v59 }
 0x1e8   : > { %1103 = vmatprep.subr.bf16.mxu0 %v2430_v60  ;;  %1144 = vmatprep.subr.bf16.mxu1 %v2432_v61 }
 0x1eb   : > { %1104 = vmatpush1.bf16.msra.mxu0 %v2436_v62  ;;  %1145 = vmatpush1.bf16.msra.mxu1 %v2438_v63 }
 0x1ec   : > { %1105 = vmatprep.subr.bf16.mxu0 %v2442_v0  ;;  %1146 = vmatprep.subr.bf16.mxu1 %v2444_v1 }
 0x1ef   : > { %1106 = vmatpush1.bf16.msra.mxu0 %v2448_v2  ;;  %1147 = vmatpush1.bf16.msra.mxu1 %v2450_v4 }
 0x1f0   : > { %1206 = vmatprep.subr.bf16.mxu0 %v2352_v34  ;;  %1247 = vmatprep.subr.bf16.mxu1 %v2354_v35 }
 0x2a5   : > { %v1010_v27 = vpop.f32.mrb[12].mxu0  ;;  %v1051_v30 = vpop.f32.mrb[12].mxu1 }
 0x2a6   : > { %v1058_v31 = vadd.f32 %v1010_v27, %v2495_v24  ;;  %v1060_v33 = vadd.f32 %v1051_v30, %v2497_v26  ;;  %v1012_v46 = vpop.f32.mrb[13].mxu0  ;;  %v1053_v6 = vpop.f32.mrb[13].mxu1 }
 0x2a7   : > { %v1059_v8 = vadd.f32 %v1012_v46, %v2499_v28  ;;  %v1061_v10 = vadd.f32 %v1053_v6, %v2501_v29  ;;  %v1014_v14 = vpop.f32.mrb[14].mxu0  ;;  %v1055_v15 = vpop.f32.mrb[14].mxu1  ;;  %v2681_v6 = vld [vmem:[#allocation22_spill] sm:$0xff] }
 0x2a8   : > { %v1605_v16 = vmul.f32 -1.442695, %v1058_v31  ;;  %v1015_v17 = vpop.f32.mrb[15].mxu0  ;;  %v1056_v18 = vpop.f32.mrb[15].mxu1 }
 0x2a9   : > { %v1606_v34 = vmul.f32 -1.442695, %v1059_v8  ;;  %v1607_v35 = vmul.f32 -1.442695, %v1061_v10  ;;  %v2682_v10 = vld [vmem:[#allocation23_spill] sm:$0xff]  ;;  %v2683_v17 = vld [vmem:[#allocation24_spill] sm:$0xff] }
 0x2aa   : > { %1857 = vpow2.f32 %v1605_v16 }
 0x2ab   : > { %1859 = vpow2.f32 %v1606_v34 }
 0x2ac   : > { %1861 = vpow2.f32 %v1607_v35 }
 0x2ad   : > { %1863 = vtanh.f32 %v1060_v33 }
 0x2b4   : > { %v1858_v19 = vpop.eup %1857 }
 0x2b5   : > { %v1860_v20 = vpop.eup %1859  ;;  %v1065_v24 = vadd.f32 1.0, %v1858_v19 }
 0x2b6   : > { %v1071_v26 = vadd.f32 1.0, %v1860_v20  ;;  %v1862_v28 = vpop.eup %1861 }
 0x2b7   : > { %1865 = vrcp.f32 %v1065_v24  ;;  %v1864_v21 = vpop.eup %1863  ;;  %v1078_v3 = vadd.f32 1.0, %v1862_v28 }
 0x2b8   : > { %1867 = vrcp.f32 %v1071_v26 }
 0x2b9   : > { %1869 = vrcp.f32 %v1078_v3 }
 0x2c1   : > { %v1866_v29 = vpop.eup %1865 }
 0x2c2   : > { %v1868_v36 = vpop.eup %1867  ;;  %v1082_v5 = vmul.f32 %v1866_v29, %v1864_v21 }
 0x2c3   : > { %v1081_v32 = vmul.f32 %v1868_v36, %v2519_v12  ;;  %v1870_v9 = vpop.eup %1869 }
 0x2c5   : > { %v2561_v7 = vadd.f32 %v1082_v5, %v1081_v32 }
 0x2c7   : > { %1871 = vtanh.f32 %v2561_v7 }
 0x2d1   : > { %v1872_v11 = vpop.eup %1871 }
 0x2d2   : > { %v1085_v13 = vmul.f32 %v1872_v11, %v1870_v9 }
 0x2d4   : > { %v1090_v23 = vpack.c.bf16 %v1085_v13, %v1085_v13 }
 0x2d6   : > { %1124 = vmatmul.mubr.bf16.vlgmr.msra.gmra.mrb[16].mxu0 %v1090_v23  ;;  %1165 = vmatmul.mubr.bf16.vlgmr.msra.gmra.mrb[16].mxu1 %v1090_v23 }
 0x2d7   : > { %1207 = vmatpush1.bf16.msra.mxu0 %v2358_v37  ;;  %1248 = vmatpush1.bf16.msra.mxu1 %v2360_v38 }
 0x2d8   : > { %1208 = vmatprep.subr.bf16.mxu0 %v2362_v39  ;;  %1249 = vmatprep.subr.bf16.mxu1 %v2366_v40  ;;  %v2677_v39 = vld [vmem:[#allocation18_spill] sm:$0xff] }
 0x2d9   : > { %1238 = vmatprep.mubr.bf16.mxu0 %v2676_v25  ;;  %1279 = vmatprep.mubr.bf16.mxu1 %v2676_v25 }
 0x2db   : > { %1209 = vmatpush1.bf16.msra.mxu0 %v2368_v41  ;;  %1250 = vmatpush1.bf16.msra.mxu1 %v2370_v42  ;;  %v2678_v41 = vld [vmem:[#allocation19_spill] sm:$0xff] }
 0x2dc   : > { %1210 = vmatprep.subr.bf16.mxu0 %v2374_v43  ;;  %1251 = vmatprep.subr.bf16.mxu1 %v2378_v44 }
 0x2df   : > { %1211 = vmatpush1.bf16.msra.mxu0 %v2380_v45  ;;  %1252 = vmatpush1.bf16.msra.mxu1 %v2388_v47  ;;  %v2679_v45 = vld [vmem:[#allocation20_spill] sm:$0xff] }
 0x2e0   : > { %1212 = vmatprep.subr.bf16.mxu0 %v2392_v48  ;;  %1253 = vmatprep.subr.bf16.mxu1 %v2394_v49  ;;  %v2680_v48 = vld [vmem:[#allocation21_spill] sm:$0xff] }
 0x2e3   : > { %1213 = vmatpush1.bf16.msra.mxu0 %v2398_v50  ;;  %1254 = vmatpush1.bf16.msra.mxu1 %v2400_v51 }
 0x2e4   : > { %1214 = vmatprep.subr.bf16.mxu0 %v2404_v52  ;;  %1255 = vmatprep.subr.bf16.mxu1 %v2406_v53 }
 0x2e7   : > { %1215 = vmatpush1.bf16.msra.mxu0 %v2412_v54  ;;  %1256 = vmatpush1.bf16.msra.mxu1 %v2414_v55 }
 0x2e8   : > { %1216 = vmatprep.subr.bf16.mxu0 %v2418_v56  ;;  %1257 = vmatprep.subr.bf16.mxu1 %v2420_v57 }
 0x2eb   : > { %1217 = vmatpush1.bf16.msra.mxu0 %v2424_v58  ;;  %1258 = vmatpush1.bf16.msra.mxu1 %v2426_v59 }
 0x2ec   : > { %1218 = vmatprep.subr.bf16.mxu0 %v2430_v60  ;;  %1259 = vmatprep.subr.bf16.mxu1 %v2432_v61 }
 0x2ef   : > { %1219 = vmatpush1.bf16.msra.mxu0 %v2436_v62  ;;  %1260 = vmatpush1.bf16.msra.mxu1 %v2438_v63 }
 0x2f0   : > { %1220 = vmatprep.subr.bf16.mxu0 %v2442_v0  ;;  %1261 = vmatprep.subr.bf16.mxu1 %v2444_v1 }
 0x2f3   : > { %1221 = vmatpush1.bf16.msra.mxu0 %v2448_v2  ;;  %1262 = vmatpush1.bf16.msra.mxu1 %v2450_v4 }
 0x3a9   : > { %v1125_v37 = vpop.f32.mrb[16].mxu0  ;;  %v1166_v38 = vpop.f32.mrb[16].mxu1 }
 0x3aa   : > { %v1173_v40 = vadd.f32 %v1125_v37, %v2677_v39  ;;  %v1175_v42 = vadd.f32 %v1166_v38, %v2678_v41  ;;  %v1127_v43 = vpop.f32.mrb[17].mxu0  ;;  %v1168_v44 = vpop.f32.mrb[17].mxu1  ;;  %v1905_v41 = vld [vmem:[#allocation11] sm:$0xff] (!%p1614_p10)  }
 0x3ab   : > { %v1174_v47 = vadd.f32 %v1127_v43, %v2679_v45  ;;  %v1176_v49 = vadd.f32 %v1168_v44, %v2680_v48  ;;  %v1129_v50 = vpop.f32.mrb[18].mxu0  ;;  %v1170_v51 = vpop.f32.mrb[18].mxu1  ;;  %v1906_v43 = vld [vmem:[#allocation11 + $0x8] sm:$0xff] (!%p1614_p10)   ;;  %v1907_v44 = vld [vmem:[#allocation11 + $0x10] sm:$0xff] (!%p1614_p10)   ;;  %v1908_v45 = vld [vmem:[#allocation11 + $0x18] sm:$0xff] (!%p1614_p10)  }
 0x3ac   : > { %v1608_v52 = vmul.f32 -1.442695, %v1173_v40  ;;  %v1130_v53 = vpop.f32.mrb[19].mxu0  ;;  %v1171_v54 = vpop.f32.mrb[19].mxu1  ;;  %v1910_v48 = vld [vmem:[#allocation11 + $0x28] sm:$0xff] (!%p1614_p10)   ;;  %v1912_v50 = vld [vmem:[#allocation11 + $0x38] sm:$0xff] (!%p1614_p10)  }
 0x3ad   : > { %v1609_v55 = vmul.f32 -1.442695, %v1174_v47  ;;  %v1610_v56 = vmul.f32 -1.442695, %v1176_v49  ;;  %v1909_v47 = vld [vmem:[#allocation11 + $0x20] sm:$0xff] (!%p1614_p10)   ;;  %v1911_v49 = vld [vmem:[#allocation11 + $0x30] sm:$0xff] (!%p1614_p10)  }
 0x3ae   : > { %1873 = vpow2.f32 %v1608_v52  ;;  %v1615_v52 = vld [vmem:[%s2650_s5] ss:$0 sm:$0xff] (!%p1614_p10) }
 0x3af   : > { %1875 = vpow2.f32 %v1609_v55 }
 0x3b0   : > { %1877 = vpow2.f32 %v1610_v56 }
 0x3b1   : > { %1879 = vtanh.f32 %v1175_v42  ;;  %v2111_v42 = vmov (!%p1614_p10), 0.0  }
 0x3b2   : > { %1638 = vmatprep.subr.bf16.mxu0 (!%p1614_p10), %v2111_v42 }
 0x3b8   : > { %v1874_v57 = vpop.eup %1873 }
 0x3b9   : > { %v1876_v58 = vpop.eup %1875  ;;  %v1180_v59 = vadd.f32 1.0, %v1874_v57 }
 0x3ba   : > { %v1186_v60 = vadd.f32 1.0, %v1876_v58  ;;  %v1878_v61 = vpop.eup %1877 }
 0x3bb   : > { %1881 = vrcp.f32 %v1180_v59  ;;  %v1880_v62 = vpop.eup %1879  ;;  %v1193_v2 = vadd.f32 1.0, %v1878_v61 }
 0x3bc   : > { %1883 = vrcp.f32 %v1186_v60 }
 0x3bd   : > { %1885 = vrcp.f32 %v1193_v2 }
 0x3c5   : > { %v1882_v63 = vpop.eup %1881 }
 0x3c6   : > { %v1884_v0 = vpop.eup %1883  ;;  %v1197_v1 = vmul.f32 %v1882_v63, %v1880_v62 }
 0x3c7   : > { %v1196_v4 = vmul.f32 %v1884_v0, %v2561_v7  ;;  %v1886_v25 = vpop.eup %1885 }
 0x3c9   : > { %v1198_v12 = vadd.f32 %v1197_v1, %v1196_v4 }
 0x3cb   : > { %1887 = vtanh.f32 %v1198_v12 }
 0x3d5   : > { %v1888_v27 = vpop.eup %1887 }
 0x3d6   : > { %v1200_v30 = vmul.f32 %v1888_v27, %v1886_v25 }
 0x3d8   : > { %v1205_v31 = vpack.c.bf16 %v1200_v30, %v1200_v30 }
 0x3da   : > { %1239 = vmatmul.mubr.bf16.vlgmr.msra.gmra.mrb[20].mxu0 %v1205_v31  ;;  %1280 = vmatmul.mubr.bf16.vlgmr.msra.gmra.mrb[20].mxu1 %v1205_v31 }
 0x3db   : > { %1639 = vmatpush3.bf16.msra.mxu0 (!%p1614_p10), %v1905_v41  ;;  %1654 = vmatprep.mubr.msk.bf16.mxu0 (!%p1614_p10), %vm2112_vm0, %v2111_v42 }
 0x3dc   : > { %1640 = vmatprep.subr.bf16.mxu0 (!%p1614_p10), %v2111_v42 }
 0x3df   : > { %1641 = vmatpush3.bf16.msra.mxu0 (!%p1614_p10), %v1906_v43 }
 0x3e0   : > { %1642 = vmatprep.subr.bf16.mxu0 (!%p1614_p10), %v2111_v42 }
 0x3e3   : > { %1643 = vmatpush3.bf16.msra.mxu0 (!%p1614_p10), %v1907_v44 }
 0x3e4   : > { %1644 = vmatprep.subr.bf16.mxu0 (!%p1614_p10), %v2111_v42 }
 0x3e7   : > { %1645 = vmatpush3.bf16.msra.mxu0 (!%p1614_p10), %v1908_v45 }
 0x3e8   : > { %1646 = vmatprep.subr.bf16.mxu0 (!%p1614_p10), %v2111_v42 }
 0x3eb   : > { %1647 = vmatpush3.bf16.msra.mxu0 (!%p1614_p10), %v1909_v47 }
 0x3ec   : > { %1648 = vmatprep.subr.bf16.mxu0 (!%p1614_p10), %v2111_v42 }
 0x3ef   : > { %1649 = vmatpush3.bf16.msra.mxu0 (!%p1614_p10), %v1910_v48 }
 0x3f0   : > { %1650 = vmatprep.subr.bf16.mxu0 (!%p1614_p10), %v2111_v42 }
 0x3f3   : > { %1651 = vmatpush3.bf16.msra.mxu0 (!%p1614_p10), %v1911_v49 }
 0x3f4   : > { %1652 = vmatprep.subr.bf16.mxu0 (!%p1614_p10), %v2111_v42 }
 0x3f7   : > { %1653 = vmatpush3.bf16.msra.mxu0 (!%p1614_p10), %v1912_v50 }
 0x4ad   : > { %v1240_v33 = vpop.f32.mrb[20].mxu0  ;;  %v1281_v46 = vpop.f32.mrb[20].mxu1 }
 0x4ae   : > { %v1288_v8 = vadd.f32 %v1240_v33, %v2681_v6  ;;  %v1290_v14 = vadd.f32 %v1281_v46, %v2682_v10  ;;  %v1242_v15 = vpop.f32.mrb[21].mxu0  ;;  %v1283_v16 = vpop.f32.mrb[21].mxu1 }
 0x4af   : > { %v1289_v18 = vadd.f32 %v1242_v15, %v2683_v17  ;;  %v1291_v34 = vadd.f32 %v1283_v16, %v2517_v22  ;;  %v1244_v35 = vpop.f32.mrb[22].mxu0  ;;  %v1285_v19 = vpop.f32.mrb[22].mxu1 }
 0x4b0   : > { %v1611_v20 = vmul.f32 -1.442695, %v1288_v8  ;;  %v1245_v24 = vpop.f32.mrb[23].mxu0  ;;  %v1286_v26 = vpop.f32.mrb[23].mxu1 }
 0x4b1   : > { %v1612_v28 = vmul.f32 -1.442695, %v1289_v18  ;;  %v1613_v21 = vmul.f32 -1.442695, %v1291_v34 }
 0x4b2   : > { %1889 = vpow2.f32 %v1611_v20 }
 0x4b3   : > { %1891 = vpow2.f32 %v1612_v28 }
 0x4b4   : > { %1893 = vpow2.f32 %v1613_v21 }
 0x4b5   : > { %1895 = vtanh.f32 %v1290_v14 }
 0x4bc   : > { %v1890_v29 = vpop.eup %1889 }
 0x4bd   : > { %v1892_v36 = vpop.eup %1891  ;;  %v1295_v5 = vadd.f32 1.0, %v1890_v29 }
 0x4be   : > { %v1301_v3 = vadd.f32 1.0, %v1892_v36  ;;  %v1894_v32 = vpop.eup %1893 }
 0x4bf   : > { %1897 = vrcp.f32 %v1295_v5  ;;  %v1896_v7 = vpop.eup %1895  ;;  %v1308_v13 = vadd.f32 1.0, %v1894_v32 }
 0x4c0   : > { %1899 = vrcp.f32 %v1301_v3 }
 0x4c1   : > { %1901 = vrcp.f32 %v1308_v13 }
 0x4c9   : > { %v1898_v22 = vpop.eup %1897 }
 0x4ca   : > { %v1900_v9 = vpop.eup %1899  ;;  %v1312_v11 = vmul.f32 %v1898_v22, %v1896_v7 }
 0x4cb   : > { %v1311_v23 = vmul.f32 %v1900_v9, %v1198_v12  ;;  %v1902_v38 = vpop.eup %1901 }
 0x4cd   : > { %v1313_v37 = vadd.f32 %v1312_v11, %v1311_v23 }
 0x4cf   : > { %1903 = vtanh.f32 %v1313_v37  ;;  %1317 = vst [vmem:[#allocation3] sm:$0xff] %v1313_v37 }
 0x4d6   : > { %1321 = sbr.rel (%p1614_p10) target bundleno = 1461 (0x5b5), region = 68 }
 0x4d9   : > { %v1904_v39 = vpop.eup %1903 }
 0x4da   : > { %v1315_v40 = vmul.f32 %v1904_v39, %v1902_v38 }
 0x4dc   : > { %1316 = vst [vmem:[#allocation2] sm:$0xff] %v1315_v40  ;;  %v1322_v51 = vpack.c.bf16 (!%p1614_p10), %v1315_v40, %v1315_v40 }
 0x4de   : > { %1655 = vmatmul.mubr.bf16.vlgmr.msra.gmra.mrb[0].mxu0 %v1322_v51 }
 0x5b1   : > { %v1428_v53 = vpop.f32.mrb[0].mxu0 }
 0x5b2   : > { %v1429_v54 = vadd.f32 %v1615_v52, %v1428_v53  ;;  %v1656_v55 = vpop.f32.mrb[1].mxu0 }
 0x5b3   : > { %v1431_v56 = vpop.f32.mrb[2].mxu0 }
 0x5b4   : > { %1434 = vst [vmem:[#allocation13] sm:$0xff] %v1429_v54  ;;  %v1657_v57 = vpop.f32.mrb[3].mxu0 }
 0x5b5 PF: > { %p1697_p12 = scmp.eq.s32.totalorder %s2168_s25, 1  ;;  %s2113_s12 = smov [#allocation13]  }
 0x5b6   : > { %s1442_s13 = sshll.u32 %s2113_s12, 4  ;;  %s1443_s13 = int_to_ptr.vmem [resolvable:$true] %s1442_s13 }
 0x5b7   : > { %s2027_s14 = scalar_lea.vmem %s1443_s13, 128  ;;  %p2034_p9 = scmp.lt.s32.totalorder %s1443_s13, %s1443_s13 }
 0x5b8   : > { %p2028_p13 = scmp.ne.s32.totalorder %s1443_s13, %s2027_s14  ;;  %p2035_p11 = scmp.lt.s32.totalorder %s2027_s14, %s2027_s14 }
 0x5ba   : > { %p2029_p0 = pnand %p2028_p13, %p1697_p12  ;;  %p2036_p2 = por %p2035_p11, %p2034_p9 }
 0x5bc   : > { %p2030_p3 = pneg %p2029_p0 }
 0x5be   : > { %p2037_p7 = pnand %p2036_p2, %p2030_p3 }
 0x5c0   : > { %2040 = shalt.err (!%p2037_p7)
}
 0x5c1   : > { %s2041_s18 = scalar_lea.hbm %s2651_s6, 128 }
 0x5c2   : > { %p2042_p1 = scmp.ne.s32.totalorder %s2651_s6, %s2041_s18  ;;  %p2047_p5 = scmp.lt.u32.totalorder %s2041_s18, %s2651_s6 }
 0x5c4   : > { %p2043_p8 = pnand %p2042_p1, %p1697_p12 }
 0x5c6   : > { %p2044_p4 = pneg %p2043_p8 }
 0x5c8   : > { %p2049_p6 = pnand %p2047_p5, %p2044_p4 }
 0x5ca   : > { %2052 = shalt.err (!%p2049_p6)
}
 0x5cb   : > { %1673 = dma.vmem_to_hbm [thread:$0]  (%p1697_p12), %s1443_s13, 128, %s2651_s6, [#allocation7]  }
 0x5cc   : > { %2082 = dma.done.wait (%p1697_p12), [#allocation7], 128  }
 0x5cd   : > { %2084 = vsyncadd (%p1697_p12), [#allocation7], 4294967168 }
 0x5ce PF: > { %p19_p10 = scmp.ge.s32.totalorder %s2274_s17, 4   ;;  %s2684_s21 = smov %s2091_s22 }
 0x5cf   : > { %s2685_s22 = smov %s2095_s23  ;;  %s2686_s23 = smov %s2284_s19 }
 0x5d0   : > { %s2687_s24 = smov %s2274_s17  ;;  %21 = sbr.rel (!%p19_p10) target bundleno = 6 (0x6), region = 101 }
 0x5d7   :  { %1455 = vsyncpa [#allocation6], 1 }
 0x5d8   :  { %1457 = vsyncpa [#allocation6 + $0x1], 1 }
 0x5d9   :  { %1458 = vsyncpa [#allocation9], 1 }
 0x5da   :  { %1459 = vsyncpa [#allocation12], 1 }
 0x5db   :  { %1460 = vsyncpa [#allocation7], 1 }
 0x5dc   :  { %1462 = vsyncpa [#allocation7 + $0x1], 1 }

</bundles_post_ra>
